<compile_context>
chip_gen: v6e
topology: v6e:2x2x1
jax: 0.10.0
libtpu: 0.0.40
codegen_flags: <defaults>
</compile_context>

<pallas_src>
import functools
import math

import jax
import jax.numpy as jnp
from jax import lax
from jax.experimental import pallas as pl
from jax.experimental.pallas import tpu as pltpu


# ----------------------------------------------------------------------------
# small helpers (pure jnp, used identically inside the kernel and the reference)
# ----------------------------------------------------------------------------
def _silu(x):
    return x * (1.0 / (1.0 + jnp.exp(-x)))


def _softplus(x):
    return jnp.where(x > 20.0, x, jnp.log(1.0 + jnp.exp(x)))


def _round_up(x, m):
    return ((x + m - 1) // m) * m


# ----------------------------------------------------------------------------
# Pallas kernel: grid = (batch, L // seq_tile).  One program = one sequence
# tile of one batch element.  SSM state + conv history carried in scratch.
# ----------------------------------------------------------------------------
def mamba_kernel(hid_ref, inw_ref, convw_ref, xpw_ref, dtw_ref, dtb_ref,
                 a_ref, d_ref, outw_ref, out_ref,
                 h_scr, xpad_scr, delta_scr, du_scr, b_scr, c_scr, y_scr,
                 *, scan_chunk, b_off, c_off):
    li = pl.program_id(1)                        # sequence-tile index (arbitrary)

    TL = hid_ref.shape[1]                        # sequence tile length
    d_state, d_inner = a_ref.shape
    d_conv = convw_ref.shape[0]
    dt_rank = dtw_ref.shape[0]
    T = scan_chunk                               # wrapper guarantees TL % T == 0
    n_chunks = TL // T

    # ---- reset carried state at the first tile of every batch element ------
    @pl.when(li == 0)
    def _():
        h_scr[...] = jnp.zeros_like(h_scr)
        xpad_scr[pl.ds(0, d_conv - 1), :] = jnp.zeros(
            (d_conv - 1, d_inner), jnp.float32)

    # ---- in_proj: (TL, d_model) @ (d_model, 2*d_inner), bf16 MXU, f32 acc --
    hid = hid_ref[0]                             # already bf16 (cast in wrapper)
    xz = jnp.dot(hid, inw_ref[...], preferred_element_type=jnp.float32)
    x = xz[:, :d_inner]                          # (TL, d_inner)
    z = xz[:, d_inner:]                          # (TL, d_inner)

    # ---- depthwise causal conv1d (no bias) via (d_conv-1)-row history ------
    # xpad rows [0, d_conv-1) hold the tail of the previous tile (zeros for
    # the first tile); rows [d_conv-1, d_conv-1+TL) hold the current tile.
    xpad_scr[pl.ds(d_conv - 1, TL), :] = x
    conv = x * convw_ref[pl.ds(d_conv - 1, 1), :]        # current-row tap from value
    for k in range(d_conv - 1):                          # tiny static loop
        conv = conv + xpad_scr[pl.ds(k, TL), :] * convw_ref[pl.ds(k, 1), :]
    # save the last d_conv-1 rows of this tile for the next tile (read before
    # overwriting rows [0, d_conv-1) — required ordering)
    tail = xpad_scr[pl.ds(TL, d_conv - 1), :]
    xpad_scr[pl.ds(0, d_conv - 1), :] = tail
    u = _silu(conv)                              # (TL, d_inner)

    # ---- x_proj: (TL, d_inner) @ (d_inner, padded width) -------------------
    # xpw is zero-padded so dt / B / C segments start on 128-lane boundaries.
    x_dbl = jnp.dot(u.astype(jnp.bfloat16), xpw_ref[...],
                    preferred_element_type=jnp.float32)
    dt_in = x_dbl[:, :dt_rank]
    b_scr[...] = x_dbl[:, b_off:b_off + d_state]          # (TL, d_state)
    c_scr[...] = x_dbl[:, c_off:c_off + d_state]          # (TL, d_state)

    # ---- dt_proj + bias + softplus ------------------------------------------
    delta = jnp.dot(dt_in.astype(jnp.bfloat16), dtw_ref[...],
                    preferred_element_type=jnp.float32)
    delta = _softplus(delta + dtb_ref[...])      # (TL, d_inner)
    delta_scr[...] = delta
    du_scr[...] = delta * u                      # delta * u, consumed per step

    # A is pre-negated / pre-exponentiated in the wrapper: (d_state, d_inner),
    # lane-dense (d_inner on lanes).
    A = a_ref[...]

    # ---- fused chunked selective scan ---------------------------------------
    # Outer chunk loop is a real (non-unrolled) loop; the scan_chunk steps
    # inside each chunk are statically unrolled.  Everything per step is a
    # single (d_state, d_inner) live slab — no (T, d_state, d_inner) temps.
    # TODO(synk): optional bf16 exp for dA on v6e/v7x (doubles EUP throughput,
    # needs numeric validation since it feeds the multiplicative recurrence).
    def chunk_body(c, h):
        s = pl.multiple_of(c * T, T)                      # aligned chunk start
        d_c = delta_scr[pl.ds(s, T), :]                   # (T, d_inner)
        du_c = du_scr[pl.ds(s, T), :]                     # (T, d_inner)
        b_c = b_scr[pl.ds(s, T), :][:, :, None]           # (T, d_state, 1)
        c_c = c_scr[pl.ds(s, T), :][:, :, None]           # (T, d_state, 1)
        y_rows = []
        for t in range(T):                                # statically unrolled
            dA_t = jnp.exp(d_c[t:t + 1, :] * A)           # (d_state, d_inner)
            dBu_t = du_c[t:t + 1, :] * b_c[t]             # (d_state, d_inner)
            h = dA_t * h + dBu_t
            # fused readout: y_t = <h, C_t>  (sublane reduction over d_state)
            y_rows.append(jnp.sum(h * c_c[t], axis=0, keepdims=True))
        y_scr[pl.ds(s, T), :] = jnp.concatenate(y_rows, axis=0)   # (T, d_inner)
        return h

    h = lax.fori_loop(0, n_chunks, chunk_body, h_scr[...])
    h_scr[...] = h                               # carry state to next tile

    # ---- skip connection, gate, out_proj ------------------------------------
    y = y_scr[...] + u * d_ref[...]
    y = y * _silu(z)
    out = jnp.dot(y.astype(jnp.bfloat16), outw_ref[...],
                  preferred_element_type=jnp.float32)      # (TL, d_model)
    out_ref[...] = out[None, :, :]


# ----------------------------------------------------------------------------
# wrapper
# ----------------------------------------------------------------------------
def mamba_forward(hidden, params, *, seq_tile=None, scan_chunk=8):
    in_w, conv_w, xp_w, dt_w, dt_b, A_log, D, out_w = params   # torch layouts
    batch, L, d_model = hidden.shape
    d_inner, d_state = A_log.shape
    d_conv = conv_w.shape[-1]
    dt_rank = dt_w.shape[1]

    # per-generation VMEM budget / default tile size
    try:
        vmem_cap = int(pltpu.get_tpu_info().vmem_capacity_bytes)
    except Exception:                                         # conservative default
        vmem_cap = 64 * 1024 * 1024
    vmem_limit = min(int(vmem_cap * 0.85), 112 * 1024 * 1024)

    if seq_tile is None:
        target = 256 if vmem_cap >= 96 * 1024 * 1024 else 128
        seq_tile = min(L, target)
        if L % seq_tile != 0:
            seq_tile = math.gcd(L, seq_tile)
    assert L % seq_tile == 0, "seq_tile must divide the sequence length"
    scan_chunk = min(scan_chunk, seq_tile)
    assert seq_tile % scan_chunk == 0, "scan_chunk must divide seq_tile"
    n_ltiles = L // seq_tile

    # pre-transposed weights (no in-kernel .T), bf16 for the MXU;
    # A is pre-negated/exponentiated and transposed to lane-dense layout.
    in_w_t = in_w.T.astype(jnp.bfloat16)          # (d_model, 2*d_inner)
    dt_w_t = dt_w.T.astype(jnp.bfloat16)          # (dt_rank, d_inner)
    out_w_t = out_w.T.astype(jnp.bfloat16)        # (d_inner, d_model)
    conv_w_t = jnp.transpose(conv_w[:, 0, :], (1, 0)).astype(jnp.float32)
    a_neg_t = (-jnp.exp(A_log.astype(jnp.float32))).T        # (d_state, d_inner)
    dt_b2 = dt_b.reshape(1, d_inner).astype(jnp.float32)
    d2 = D.reshape(1, d_inner).astype(jnp.float32)

    # x_proj weight, zero-padded so dt / B / C output segments each start on a
    # 128-lane boundary (aligned slices, unmasked MXU stores).
    b_off = _round_up(dt_rank, 128)
    c_off = b_off + _round_up(d_state, 128)
    xp_width = c_off + _round_up(d_state, 128)
    xp_w_t = xp_w.T.astype(jnp.bfloat16)          # (d_inner, dt_rank+2*d_state)
    xp_w_pad = jnp.zeros((d_inner, xp_width), jnp.bfloat16)
    xp_w_pad = xp_w_pad.at[:, :dt_rank].set(xp_w_t[:, :dt_rank])
    xp_w_pad = xp_w_pad.at[:, b_off:b_off + d_state].set(
        xp_w_t[:, dt_rank:dt_rank + d_state])
    xp_w_pad = xp_w_pad.at[:, c_off:c_off + d_state].set(
        xp_w_t[:, dt_rank + d_state:])

    # constant-index weights: single-buffered (DMA'd once, half the residency).
    # TODO(synk): for huge d_model/d_inner on v7x, keep in_w_t/out_w_t in HBM
    # (memory_space=pl.ANY) and stream K/N tiles with pltpu.emit_pipeline.
    def wspec(shape):
        return pl.BlockSpec(shape, lambda b, li: (0,) * len(shape),
                            pipeline_mode=pl.Buffered(1))

    grid_spec = pltpu.PrefetchScalarGridSpec(
        num_scalar_prefetch=0,
        # NOTE: batch must stay the outer ("parallel") axis and the sequence
        # axis must stay innermost and "arbitrary" — state/conv-history carry
        # depends on sequential per-batch iteration over sequence tiles.
        grid=(batch, n_ltiles),
        in_specs=[
            pl.BlockSpec((1, seq_tile, d_model), lambda b, li: (b, li, 0)),
            wspec(in_w_t.shape),
            wspec(conv_w_t.shape),
            wspec(xp_w_pad.shape),
            wspec(dt_w_t.shape),
            wspec(dt_b2.shape),
            wspec(a_neg_t.shape),
            wspec(d2.shape),
            wspec(out_w_t.shape),
        ],
        out_specs=pl.BlockSpec((1, seq_tile, d_model), lambda b, li: (b, li, 0)),
        scratch_shapes=[
            pltpu.VMEM((d_state, d_inner), jnp.float32),                 # h carry
            pltpu.VMEM((seq_tile + d_conv - 1, d_inner), jnp.float32),   # conv hist
            pltpu.VMEM((seq_tile, d_inner), jnp.float32),                # delta
            pltpu.VMEM((seq_tile, d_inner), jnp.float32),                # delta*u
            pltpu.VMEM((seq_tile, d_state), jnp.float32),                # B
            pltpu.VMEM((seq_tile, d_state), jnp.float32),                # C
            pltpu.VMEM((seq_tile, d_inner), jnp.float32),                # y
        ],
    )
    kernel = functools.partial(mamba_kernel, scan_chunk=scan_chunk,
                               b_off=b_off, c_off=c_off)
    return pl.pallas_call(
        kernel,
        out_shape=jax.ShapeDtypeStruct((batch, L, d_model), jnp.float32),
        grid_spec=grid_spec,
        compiler_params=pltpu.CompilerParams(
            dimension_semantics=("parallel", "arbitrary"),
            vmem_limit_bytes=vmem_limit),
    )(hidden.astype(jnp.bfloat16), in_w_t, conv_w_t, xp_w_pad, dt_w_t,
      dt_b2, a_neg_t, d2, out_w_t)


# ----------------------------------------------------------------------------
# deterministic parameter init (mirrors the module's __init__ semantics),
# parameters kept in the original torch layouts.
# ----------------------------------------------------------------------------
def init_params(key, d_model, d_inner, d_state, dt_rank, d_conv,
                dt_min=1e-3, dt_max=1e-1, dt_init_floor=1e-4):
    ks = jax.random.split(key, 6)

    def kaiming(k, shape, fan_in):
        return jax.random.normal(k, shape, jnp.float32) * math.sqrt(2.0 / fan_in)

    in_w = kaiming(ks[0], (2 * d_inner, d_model), d_model)
    conv_w = kaiming(ks[1], (d_inner, 1, d_conv), d_inner)       # torch (D,1,K)
    xp_w = kaiming(ks[2], (dt_rank + 2 * d_state, d_inner), d_inner)
    dt_w = kaiming(ks[3], (d_inner, dt_rank), dt_rank)

    # init_dtprojbias
    u = jax.random.uniform(ks[4], (d_inner,), jnp.float32)
    dt = jnp.exp(u * (math.log(dt_max) - math.log(dt_min)) + math.log(dt_min))
    dt = jnp.maximum(dt, dt_init_floor)
    dt_b = dt + jnp.log(-jnp.expm1(-dt))

    # init_A: A_log = log(repeat(arange(1, d_state+1), 'n -> d n'))
    A_log = jnp.log(jnp.tile(jnp.arange(1, d_state + 1, dtype=jnp.float32),
                             (d_inner, 1)))
    D = jnp.ones((d_inner,), jnp.float32)
    out_w = kaiming(ks[5], (d_model, d_inner), d_model)
    return (in_w, conv_w, xp_w, dt_w, dt_b, A_log, D, out_w)


# ----------------------------------------------------------------------------
# pure-JAX reference (same math and same bf16-matmul / f32-accumulate policy)
# ----------------------------------------------------------------------------
def mamba_reference(hidden, params):
    in_w, conv_w, xp_w, dt_w, dt_b, A_log, D, out_w = params
    batch, L, d_model = hidden.shape
    d_inner, d_state = A_log.shape
    d_conv = conv_w.shape[-1]
    dt_rank = dt_w.shape[1]

    def dot(a, w_t):   # bf16 operands, f32 accumulation (matches kernel)
        return jnp.dot(a.astype(jnp.bfloat16), w_t.astype(jnp.bfloat16),
                       preferred_element_type=jnp.float32)

    conv_w_t = jnp.transpose(conv_w[:, 0, :], (1, 0))            # (K, d_inner)

    xz = dot(hidden.reshape(batch * L, d_model), in_w.T).reshape(
        batch, L, 2 * d_inner)
    x, z = xz[..., :d_inner], xz[..., d_inner:]
    x_pad = jnp.pad(x, ((0, 0), (d_conv - 1, 0), (0, 0)))
    conv = sum(x_pad[:, k:k + L, :] * conv_w_t[k][None, None, :]
               for k in range(d_conv))
    u = _silu(conv)
    x_dbl = dot(u.reshape(batch * L, d_inner), xp_w.T).reshape(batch, L, -1)
    dt_in = x_dbl[..., :dt_rank]
    Bm = x_dbl[..., dt_rank:dt_rank + d_state]
    Cm = x_dbl[..., dt_rank + d_state:]
    delta = _softplus(
        dot(dt_in.reshape(batch * L, dt_rank), dt_w.T).reshape(batch, L, d_inner)
        + dt_b[None, None, :])
    A = -jnp.exp(A_log)
    dA = jnp.exp(delta[..., None] * A[None, None, :, :])         # (b,l,d,n)
    dBu = (delta * u)[..., None] * Bm[:, :, None, :]              # (b,l,d,n)

    def step(h, inp):
        dA_l, dBu_l = inp
        h = dA_l * h + dBu_l
        return h, h

    _, hs = lax.scan(step,
                     jnp.zeros((batch, d_inner, d_state), jnp.float32),
                     (jnp.moveaxis(dA, 1, 0), jnp.moveaxis(dBu, 1, 0)))
    hs = jnp.moveaxis(hs, 0, 1)                                   # (b,l,d,n)
    y = jnp.sum(hs * Cm[:, :, None, :], axis=-1) + u * D[None, None, :]
    y = y * _silu(z)
    return dot(y.reshape(batch * L, d_inner), out_w.T).reshape(batch, L, d_model)


# ----------------------------------------------------------------------------
if __name__ == "__main__":
    batch, seqlen, d_model = 2, 32, 32
    d_inner = 2 * d_model                 # 64
    d_state = 16
    dt_rank = math.ceil(d_model / 16)     # 2
    d_conv = 4

    key = jax.random.PRNGKey(0)
    k_h, k_p = jax.random.split(key)
    hidden = jax.random.normal(k_h, (batch, seqlen, d_model), jnp.float32)
    params = init_params(k_p, d_model, d_inner, d_state, dt_rank, d_conv)

    # seq_tile=16 < seqlen=32 so the cross-tile state / conv-history carry and
    # the chunked scan (scan_chunk=8 -> 2 chunks per tile) are all exercised.
    out = mamba_forward(hidden, params, seq_tile=16, scan_chunk=8)
    out = jax.block_until_ready(out)

    ref = jax.block_until_ready(mamba_reference(hidden, params))
    assert out.shape == (batch, seqlen, d_model)
    max_err = float(jnp.max(jnp.abs(out - ref)))
    assert jnp.allclose(out, ref, rtol=1e-2, atol=1e-2), max_err

    print("KERNEL_OK")
</pallas_src>

<mosaic_0001>
module attributes {stable_mosaic.version = 11 : i64} {
  func.func @mamba_kernel(%arg0: i32, %arg1: i32, %arg2: memref<1x16x32xbf16, #tpu.memory_space<vmem>>, %arg3: memref<32x128xbf16, #tpu.memory_space<vmem>>, %arg4: memref<4x64xf32, #tpu.memory_space<vmem>>, %arg5: memref<64x384xbf16, #tpu.memory_space<vmem>>, %arg6: memref<2x64xbf16, #tpu.memory_space<vmem>>, %arg7: memref<1x64xf32, #tpu.memory_space<vmem>>, %arg8: memref<16x64xf32, #tpu.memory_space<vmem>>, %arg9: memref<1x64xf32, #tpu.memory_space<vmem>>, %arg10: memref<64x32xbf16, #tpu.memory_space<vmem>>, %arg11: memref<1x16x32xf32, #tpu.memory_space<vmem>>, %arg12: memref<16x64xf32, #tpu.memory_space<vmem>>, %arg13: memref<19x64xf32, #tpu.memory_space<vmem>>, %arg14: memref<16x64xf32, #tpu.memory_space<vmem>>, %arg15: memref<16x64xf32, #tpu.memory_space<vmem>>, %arg16: memref<16x16xf32, #tpu.memory_space<vmem>>, %arg17: memref<16x16xf32, #tpu.memory_space<vmem>>, %arg18: memref<16x64xf32, #tpu.memory_space<vmem>>) attributes {dimension_semantics = [#tpu.dimension_semantics<parallel>, #tpu.dimension_semantics<arbitrary>], iteration_bounds = array<i64: 2, 2>, scalar_prefetch = 0 : i64, scratch_operands = 7 : i64, tpu.core_type = #tpu.core_type<tc>, window_params = [{transform_indices = @transform_0, window_bounds = array<i64: 1, 16, 32>}, {pipeline_mode = #tpu.pipeline_mode<synchronous>, transform_indices = @transform_1, window_bounds = array<i64: 32, 128>}, {pipeline_mode = #tpu.pipeline_mode<synchronous>, transform_indices = @transform_2, window_bounds = array<i64: 4, 64>}, {pipeline_mode = #tpu.pipeline_mode<synchronous>, transform_indices = @transform_3, window_bounds = array<i64: 64, 384>}, {pipeline_mode = #tpu.pipeline_mode<synchronous>, transform_indices = @transform_4, window_bounds = array<i64: 2, 64>}, {pipeline_mode = #tpu.pipeline_mode<synchronous>, transform_indices = @transform_5, window_bounds = array<i64: 1, 64>}, {pipeline_mode = #tpu.pipeline_mode<synchronous>, transform_indices = @transform_6, window_bounds = array<i64: 16, 64>}, {pipeline_mode = #tpu.pipeline_mode<synchronous>, transform_indices = @transform_7, window_bounds = array<i64: 1, 64>}, {pipeline_mode = #tpu.pipeline_mode<synchronous>, transform_indices = @transform_8, window_bounds = array<i64: 64, 32>}, {transform_indices = @transform_9, window_bounds = array<i64: 1, 16, 32>}]} {
    %c0_i32 = arith.constant 0 : i32
    %0 = arith.cmpi eq, %arg1, %c0_i32 : i32
    %1 = arith.extui %0 : i1 to i32
    %c0_i32_0 = arith.constant 0 : i32
    %2 = arith.cmpi ne, %1, %c0_i32_0 : i32
    scf.if %2 {
      %cst_63 = arith.constant 0.000000e+00 : f32
      %86 = vector.broadcast %cst_63 : f32 to vector<16x64xf32>
      %c0_64 = arith.constant 0 : index
      %c0_65 = arith.constant 0 : index
      %87 = vector.load %arg12[%c0_64, %c0_65] : memref<16x64xf32, #tpu.memory_space<vmem>>, vector<16x64xf32>
      tpu.vector_store %arg12[%c0_64, %c0_65], %86 {strides = array<i32>} : memref<16x64xf32, #tpu.memory_space<vmem>>, vector<16x64xf32>,
      %cst_66 = arith.constant 0.000000e+00 : f32
      %88 = vector.broadcast %cst_66 : f32 to vector<3x64xf32>
      %c0_67 = arith.constant 0 : index
      %c0_68 = arith.constant 0 : index
      %89 = vector.load %arg13[%c0_67, %c0_68] : memref<19x64xf32, #tpu.memory_space<vmem>>, vector<3x64xf32>
      tpu.vector_store %arg13[%c0_67, %c0_68], %88 {strides = array<i32>} : memref<19x64xf32, #tpu.memory_space<vmem>>, vector<3x64xf32>,
    } else {
    }
    %c0 = arith.constant 0 : index
    %c0_1 = arith.constant 0 : index
    %c0_2 = arith.constant 0 : index
    %3 = vector.load %arg2[%c0, %c0_1, %c0_2] : memref<1x16x32xbf16, #tpu.memory_space<vmem>>, vector<1x16x32xbf16>
    %4 = vector.shape_cast %3 : vector<1x16x32xbf16> to vector<16x32xbf16>
    %c0_3 = arith.constant 0 : index
    %c0_4 = arith.constant 0 : index
    %5 = vector.load %arg3[%c0_3, %c0_4] : memref<32x128xbf16, #tpu.memory_space<vmem>>, vector<32x128xbf16>
    %cst = arith.constant dense<0.000000e+00> : vector<16x128xf32>
    %6 = tpu.matmul %4, %5, %cst {dimension_numbers = #tpu.dot_dimension_numbers<[1], [0], [0], [1], [0, 0, 1, 1], [], []>} : vector<16x32xbf16>, vector<32x128xbf16>, vector<16x128xf32> -> vector<16x128xf32>
    %7 = vector.extract_strided_slice %6 {offsets = [0, 0], sizes = [16, 64], strides = [1, 1]} : vector<16x128xf32> to vector<16x64xf32>
    %8 = vector.extract_strided_slice %6 {offsets = [0, 64], sizes = [16, 64], strides = [1, 1]} : vector<16x128xf32> to vector<16x64xf32>
    %c3 = arith.constant 3 : index
    %c0_5 = arith.constant 0 : index
    %9 = vector.load %arg13[%c3, %c0_5] : memref<19x64xf32, #tpu.memory_space<vmem>>, vector<16x64xf32>
    tpu.vector_store %arg13[%c3, %c0_5], %7 {strides = array<i32>} : memref<19x64xf32, #tpu.memory_space<vmem>>, vector<16x64xf32>,
    %c3_6 = arith.constant 3 : index
    %c0_7 = arith.constant 0 : index
    %10 = vector.load %arg4[%c3_6, %c0_7] : memref<4x64xf32, #tpu.memory_space<vmem>>, vector<1x64xf32>
    %11 = vector.broadcast %10 : vector<1x64xf32> to vector<16x64xf32>
    %12 = arith.mulf %7, %11 : vector<16x64xf32>
    %c0_8 = arith.constant 0 : index
    %c0_9 = arith.constant 0 : index
    %13 = vector.load %arg13[%c0_8, %c0_9] : memref<19x64xf32, #tpu.memory_space<vmem>>, vector<16x64xf32>
    %c0_10 = arith.constant 0 : index
    %c0_11 = arith.constant 0 : index
    %14 = vector.load %arg4[%c0_10, %c0_11] : memref<4x64xf32, #tpu.memory_space<vmem>>, vector<1x64xf32>
    %15 = vector.broadcast %14 : vector<1x64xf32> to vector<16x64xf32>
    %16 = arith.mulf %13, %15 : vector<16x64xf32>
    %17 = arith.addf %12, %16 : vector<16x64xf32>
    %c1 = arith.constant 1 : index
    %c0_12 = arith.constant 0 : index
    %18 = vector.load %arg13[%c1, %c0_12] : memref<19x64xf32, #tpu.memory_space<vmem>>, vector<16x64xf32>
    %c1_13 = arith.constant 1 : index
    %c0_14 = arith.constant 0 : index
    %19 = vector.load %arg4[%c1_13, %c0_14] : memref<4x64xf32, #tpu.memory_space<vmem>>, vector<1x64xf32>
    %20 = vector.broadcast %19 : vector<1x64xf32> to vector<16x64xf32>
    %21 = arith.mulf %18, %20 : vector<16x64xf32>
    %22 = arith.addf %17, %21 : vector<16x64xf32>
    %c2 = arith.constant 2 : index
    %c0_15 = arith.constant 0 : index
    %23 = vector.load %arg13[%c2, %c0_15] : memref<19x64xf32, #tpu.memory_space<vmem>>, vector<16x64xf32>
    %c2_16 = arith.constant 2 : index
    %c0_17 = arith.constant 0 : index
    %24 = vector.load %arg4[%c2_16, %c0_17] : memref<4x64xf32, #tpu.memory_space<vmem>>, vector<1x64xf32>
    %25 = vector.broadcast %24 : vector<1x64xf32> to vector<16x64xf32>
    %26 = arith.mulf %23, %25 : vector<16x64xf32>
    %27 = arith.addf %22, %26 : vector<16x64xf32>
    %c16 = arith.constant 16 : index
    %c0_18 = arith.constant 0 : index
    %28 = vector.load %arg13[%c16, %c0_18] : memref<19x64xf32, #tpu.memory_space<vmem>>, vector<3x64xf32>
    %c0_19 = arith.constant 0 : index
    %c0_20 = arith.constant 0 : index
    %29 = vector.load %arg13[%c0_19, %c0_20] : memref<19x64xf32, #tpu.memory_space<vmem>>, vector<3x64xf32>
    tpu.vector_store %arg13[%c0_19, %c0_20], %28 {strides = array<i32>} : memref<19x64xf32, #tpu.memory_space<vmem>>, vector<3x64xf32>,
    %cst_21 = arith.constant 0.000000e+00 : f32
    %30 = vector.broadcast %cst_21 : f32 to vector<16x64xf32>
    %31 = arith.subf %30, %27 : vector<16x64xf32>
    %32 = math.exp %31 : vector<16x64xf32>
    %cst_22 = arith.constant 1.000000e+00 : f32
    %33 = vector.broadcast %cst_22 : f32 to vector<16x64xf32>
    %34 = arith.addf %33, %32 : vector<16x64xf32>
    %cst_23 = arith.constant 1.000000e+00 : f32
    %35 = vector.broadcast %cst_23 : f32 to vector<16x64xf32>
    %36 = arith.divf %35, %34 : vector<16x64xf32>
    %37 = arith.mulf %27, %36 : vector<16x64xf32>
    %38 = arith.truncf %37 : vector<16x64xf32> to vector<16x64xbf16>
    %c0_24 = arith.constant 0 : index
    %c0_25 = arith.constant 0 : index
    %39 = vector.load %arg5[%c0_24, %c0_25] : memref<64x384xbf16, #tpu.memory_space<vmem>>, vector<64x384xbf16>
    %cst_26 = arith.constant dense<0.000000e+00> : vector<16x384xf32>
    %40 = tpu.matmul %38, %39, %cst_26 {dimension_numbers = #tpu.dot_dimension_numbers<[1], [0], [0], [1], [0, 0, 1, 1], [], []>} : vector<16x64xbf16>, vector<64x384xbf16>, vector<16x384xf32> -> vector<16x384xf32>
    %41 = vector.extract_strided_slice %40 {offsets = [0, 0], sizes = [16, 2], strides = [1, 1]} : vector<16x384xf32> to vector<16x2xf32>
    %42 = vector.extract_strided_slice %40 {offsets = [0, 128], sizes = [16, 16], strides = [1, 1]} : vector<16x384xf32> to vector<16x16xf32>
    %c0_27 = arith.constant 0 : index
    %c0_28 = arith.constant 0 : index
    %43 = vector.load %arg16[%c0_27, %c0_28] : memref<16x16xf32, #tpu.memory_space<vmem>>, vector<16x16xf32>
    tpu.vector_store %arg16[%c0_27, %c0_28], %42 {strides = array<i32>} : memref<16x16xf32, #tpu.memory_space<vmem>>, vector<16x16xf32>,
    %44 = vector.extract_strided_slice %40 {offsets = [0, 256], sizes = [16, 16], strides = [1, 1]} : vector<16x384xf32> to vector<16x16xf32>
    %c0_29 = arith.constant 0 : index
    %c0_30 = arith.constant 0 : index
    %45 = vector.load %arg17[%c0_29, %c0_30] : memref<16x16xf32, #tpu.memory_space<vmem>>, vector<16x16xf32>
    tpu.vector_store %arg17[%c0_29, %c0_30], %44 {strides = array<i32>} : memref<16x16xf32, #tpu.memory_space<vmem>>, vector<16x16xf32>,
    %46 = arith.truncf %41 : vector<16x2xf32> to vector<16x2xbf16>
    %c0_31 = arith.constant 0 : index
    %c0_32 = arith.constant 0 : index
    %47 = vector.load %arg6[%c0_31, %c0_32] : memref<2x64xbf16, #tpu.memory_space<vmem>>, vector<2x64xbf16>
    %cst_33 = arith.constant dense<0.000000e+00> : vector<16x64xf32>
    %48 = tpu.matmul %46, %47, %cst_33 {dimension_numbers = #tpu.dot_dimension_numbers<[1], [0], [0], [1], [0, 0, 1, 1], [], []>} : vector<16x2xbf16>, vector<2x64xbf16>, vector<16x64xf32> -> vector<16x64xf32>
    %c0_34 = arith.constant 0 : index
    %c0_35 = arith.constant 0 : index
    %49 = vector.load %arg7[%c0_34, %c0_35] : memref<1x64xf32, #tpu.memory_space<vmem>>, vector<1x64xf32>
    %50 = vector.broadcast %49 : vector<1x64xf32> to vector<16x64xf32>
    %51 = arith.addf %48, %50 : vector<16x64xf32>
    %cst_36 = arith.constant 2.000000e+01 : f32
    %52 = vector.broadcast %cst_36 : f32 to vector<16x64xf32>
    %53 = arith.cmpf ogt, %51, %52 : vector<16x64xf32>
    %54 = math.exp %51 : vector<16x64xf32>
    %cst_37 = arith.constant 1.000000e+00 : f32
    %55 = vector.broadcast %cst_37 : f32 to vector<16x64xf32>
    %56 = arith.addf %55, %54 : vector<16x64xf32>
    %57 = math.log %56 : vector<16x64xf32>
    %58 = arith.select %53, %51, %57 : vector<16x64xi1>, vector<16x64xf32>
    %c0_38 = arith.constant 0 : index
    %c0_39 = arith.constant 0 : index
    %59 = vector.load %arg14[%c0_38, %c0_39] : memref<16x64xf32, #tpu.memory_space<vmem>>, vector<16x64xf32>
    tpu.vector_store %arg14[%c0_38, %c0_39], %58 {strides = array<i32>} : memref<16x64xf32, #tpu.memory_space<vmem>>, vector<16x64xf32>,
    %60 = arith.mulf %58, %37 : vector<16x64xf32>
    %c0_40 = arith.constant 0 : index
    %c0_41 = arith.constant 0 : index
    %61 = vector.load %arg15[%c0_40, %c0_41] : memref<16x64xf32, #tpu.memory_space<vmem>>, vector<16x64xf32>
    tpu.vector_store %arg15[%c0_40, %c0_41], %60 {strides = array<i32>} : memref<16x64xf32, #tpu.memory_space<vmem>>, vector<16x64xf32>,
    %c0_42 = arith.constant 0 : index
    %c0_43 = arith.constant 0 : index
    %62 = vector.load %arg8[%c0_42, %c0_43] : memref<16x64xf32, #tpu.memory_space<vmem>>, vector<16x64xf32>
    %c0_44 = arith.constant 0 : index
    %c0_45 = arith.constant 0 : index
    %63 = vector.load %arg12[%c0_44, %c0_45] : memref<16x64xf32, #tpu.memory_space<vmem>>, vector<16x64xf32>
    %c0_i32_46 = arith.constant 0 : i32
    %c2_i32 = arith.constant 2 : i32
    %64 = arith.addi %c0_i32_46, %c2_i32 : i32
    %c1_i32 = arith.constant 1 : i32
    %65 = scf.for %arg19 = %c0_i32_46 to %64 step %c1_i32 iter_args(%arg20 = %63) -> (vector<16x64xf32>)  : i32 {
      %c8_i32 = arith.constant 8 : i32
      %86 = arith.muli %arg19, %c8_i32 : i32
      %87 = tpu.assume_multiple %86, 8 : i32
      %88 = arith.index_cast %87 : i32 to index
      %c0_63 = arith.constant 0 : index
      %89 = vector.load %arg14[%88, %c0_63] : memref<16x64xf32, #tpu.memory_space<vmem>>, vector<8x64xf32>
      %90 = arith.index_cast %87 : i32 to index
      %c0_64 = arith.constant 0 : index
      %91 = vector.load %arg15[%90, %c0_64] : memref<16x64xf32, #tpu.memory_space<vmem>>, vector<8x64xf32>
      %92 = arith.index_cast %87 : i32 to index
      %c0_65 = arith.constant 0 : index
      %93 = vector.load %arg16[%92, %c0_65] : memref<16x16xf32, #tpu.memory_space<vmem>>, vector<8x16xf32>
      %94 = vector.shape_cast %93 : vector<8x16xf32> to vector<8x16x1xf32>
      %95 = arith.index_cast %87 : i32 to index
      %c0_66 = arith.constant 0 : index
      %96 = vector.load %arg17[%95, %c0_66] : memref<16x16xf32, #tpu.memory_space<vmem>>, vector<8x16xf32>
      %97 = vector.shape_cast %96 : vector<8x16xf32> to vector<8x16x1xf32>
      %98 = vector.extract_strided_slice %89 {offsets = [0, 0], sizes = [1, 64], strides = [1, 1]} : vector<8x64xf32> to vector<1x64xf32>
      %99 = vector.broadcast %98 : vector<1x64xf32> to vector<16x64xf32>
      %100 = arith.mulf %99, %62 : vector<16x64xf32>
      %101 = math.exp %100 : vector<16x64xf32>
      %102 = vector.extract_strided_slice %91 {offsets = [0, 0], sizes = [1, 64], strides = [1, 1]} : vector<8x64xf32> to vector<1x64xf32>
      %103 = vector.extract_strided_slice %94 {offsets = [0, 0, 0], sizes = [1, 16, 1], strides = [1, 1, 1]} : vector<8x16x1xf32> to vector<1x16x1xf32>
      %104 = vector.shape_cast %103 : vector<1x16x1xf32> to vector<16x1xf32>
      %105 = vector.broadcast %102 : vector<1x64xf32> to vector<16x64xf32>
      %106 = vector.broadcast %104 : vector<16x1xf32> to vector<16x64xf32>
      %107 = arith.mulf %105, %106 : vector<16x64xf32>
      %108 = arith.mulf %101, %arg20 : vector<16x64xf32>
      %109 = arith.addf %108, %107 : vector<16x64xf32>
      %110 = vector.extract_strided_slice %97 {offsets = [0, 0, 0], sizes = [1, 16, 1], strides = [1, 1, 1]} : vector<8x16x1xf32> to vector<1x16x1xf32>
      %111 = vector.shape_cast %110 : vector<1x16x1xf32> to vector<16x1xf32>
      %112 = vector.broadcast %111 : vector<16x1xf32> to vector<16x64xf32>
      %113 = arith.mulf %109, %112 : vector<16x64xf32>
      %cst_67 = arith.constant dense<0.000000e+00> : vector<64xf32>
      %114 = vector.multi_reduction <add>, %113, %cst_67 [0] : vector<16x64xf32> to vector<64xf32>
      %115 = vector.shape_cast %114 : vector<64xf32> to vector<1x64xf32>
      %116 = vector.extract_strided_slice %89 {offsets = [1, 0], sizes = [1, 64], strides = [1, 1]} : vector<8x64xf32> to vector<1x64xf32>
      %117 = vector.broadcast %116 : vector<1x64xf32> to vector<16x64xf32>
      %118 = arith.mulf %117, %62 : vector<16x64xf32>
      %119 = math.exp %118 : vector<16x64xf32>
      %120 = vector.extract_strided_slice %91 {offsets = [1, 0], sizes = [1, 64], strides = [1, 1]} : vector<8x64xf32> to vector<1x64xf32>
      %121 = vector.extract_strided_slice %94 {offsets = [1, 0, 0], sizes = [1, 16, 1], strides = [1, 1, 1]} : vector<8x16x1xf32> to vector<1x16x1xf32>
      %122 = vector.shape_cast %121 : vector<1x16x1xf32> to vector<16x1xf32>
      %123 = vector.broadcast %120 : vector<1x64xf32> to vector<16x64xf32>
      %124 = vector.broadcast %122 : vector<16x1xf32> to vector<16x64xf32>
      %125 = arith.mulf %123, %124 : vector<16x64xf32>
      %126 = arith.mulf %119, %109 : vector<16x64xf32>
      %127 = arith.addf %126, %125 : vector<16x64xf32>
      %128 = vector.extract_strided_slice %97 {offsets = [1, 0, 0], sizes = [1, 16, 1], strides = [1, 1, 1]} : vector<8x16x1xf32> to vector<1x16x1xf32>
      %129 = vector.shape_cast %128 : vector<1x16x1xf32> to vector<16x1xf32>
      %130 = vector.broadcast %129 : vector<16x1xf32> to vector<16x64xf32>
      %131 = arith.mulf %127, %130 : vector<16x64xf32>
      %cst_68 = arith.constant dense<0.000000e+00> : vector<64xf32>
      %132 = vector.multi_reduction <add>, %131, %cst_68 [0] : vector<16x64xf32> to vector<64xf32>
      %133 = vector.shape_cast %132 : vector<64xf32> to vector<1x64xf32>
      %134 = vector.extract_strided_slice %89 {offsets = [2, 0], sizes = [1, 64], strides = [1, 1]} : vector<8x64xf32> to vector<1x64xf32>
      %135 = vector.broadcast %134 : vector<1x64xf32> to vector<16x64xf32>
      %136 = arith.mulf %135, %62 : vector<16x64xf32>
      %137 = math.exp %136 : vector<16x64xf32>
      %138 = vector.extract_strided_slice %91 {offsets = [2, 0], sizes = [1, 64], strides = [1, 1]} : vector<8x64xf32> to vector<1x64xf32>
      %139 = vector.extract_strided_slice %94 {offsets = [2, 0, 0], sizes = [1, 16, 1], strides = [1, 1, 1]} : vector<8x16x1xf32> to vector<1x16x1xf32>
      %140 = vector.shape_cast %139 : vector<1x16x1xf32> to vector<16x1xf32>
      %141 = vector.broadcast %138 : vector<1x64xf32> to vector<16x64xf32>
      %142 = vector.broadcast %140 : vector<16x1xf32> to vector<16x64xf32>
      %143 = arith.mulf %141, %142 : vector<16x64xf32>
      %144 = arith.mulf %137, %127 : vector<16x64xf32>
      %145 = arith.addf %144, %143 : vector<16x64xf32>
      %146 = vector.extract_strided_slice %97 {offsets = [2, 0, 0], sizes = [1, 16, 1], strides = [1, 1, 1]} : vector<8x16x1xf32> to vector<1x16x1xf32>
      %147 = vector.shape_cast %146 : vector<1x16x1xf32> to vector<16x1xf32>
      %148 = vector.broadcast %147 : vector<16x1xf32> to vector<16x64xf32>
      %149 = arith.mulf %145, %148 : vector<16x64xf32>
      %cst_69 = arith.constant dense<0.000000e+00> : vector<64xf32>
      %150 = vector.multi_reduction <add>, %149, %cst_69 [0] : vector<16x64xf32> to vector<64xf32>
      %151 = vector.shape_cast %150 : vector<64xf32> to vector<1x64xf32>
      %152 = vector.extract_strided_slice %89 {offsets = [3, 0], sizes = [1, 64], strides = [1, 1]} : vector<8x64xf32> to vector<1x64xf32>
      %153 = vector.broadcast %152 : vector<1x64xf32> to vector<16x64xf32>
      %154 = arith.mulf %153, %62 : vector<16x64xf32>
      %155 = math.exp %154 : vector<16x64xf32>
      %156 = vector.extract_strided_slice %91 {offsets = [3, 0], sizes = [1, 64], strides = [1, 1]} : vector<8x64xf32> to vector<1x64xf32>
      %157 = vector.extract_strided_slice %94 {offsets = [3, 0, 0], sizes = [1, 16, 1], strides = [1, 1, 1]} : vector<8x16x1xf32> to vector<1x16x1xf32>
      %158 = vector.shape_cast %157 : vector<1x16x1xf32> to vector<16x1xf32>
      %159 = vector.broadcast %156 : vector<1x64xf32> to vector<16x64xf32>
      %160 = vector.broadcast %158 : vector<16x1xf32> to vector<16x64xf32>
      %161 = arith.mulf %159, %160 : vector<16x64xf32>
      %162 = arith.mulf %155, %145 : vector<16x64xf32>
      %163 = arith.addf %162, %161 : vector<16x64xf32>
      %164 = vector.extract_strided_slice %97 {offsets = [3, 0, 0], sizes = [1, 16, 1], strides = [1, 1, 1]} : vector<8x16x1xf32> to vector<1x16x1xf32>
      %165 = vector.shape_cast %164 : vector<1x16x1xf32> to vector<16x1xf32>
      %166 = vector.broadcast %165 : vector<16x1xf32> to vector<16x64xf32>
      %167 = arith.mulf %163, %166 : vector<16x64xf32>
      %cst_70 = arith.constant dense<0.000000e+00> : vector<64xf32>
      %168 = vector.multi_reduction <add>, %167, %cst_70 [0] : vector<16x64xf32> to vector<64xf32>
      %169 = vector.shape_cast %168 : vector<64xf32> to vector<1x64xf32>
      %170 = vector.extract_strided_slice %89 {offsets = [4, 0], sizes = [1, 64], strides = [1, 1]} : vector<8x64xf32> to vector<1x64xf32>
      %171 = vector.broadcast %170 : vector<1x64xf32> to vector<16x64xf32>
      %172 = arith.mulf %171, %62 : vector<16x64xf32>
      %173 = math.exp %172 : vector<16x64xf32>
      %174 = vector.extract_strided_slice %91 {offsets = [4, 0], sizes = [1, 64], strides = [1, 1]} : vector<8x64xf32> to vector<1x64xf32>
      %175 = vector.extract_strided_slice %94 {offsets = [4, 0, 0], sizes = [1, 16, 1], strides = [1, 1, 1]} : vector<8x16x1xf32> to vector<1x16x1xf32>
      %176 = vector.shape_cast %175 : vector<1x16x1xf32> to vector<16x1xf32>
      %177 = vector.broadcast %174 : vector<1x64xf32> to vector<16x64xf32>
      %178 = vector.broadcast %176 : vector<16x1xf32> to vector<16x64xf32>
      %179 = arith.mulf %177, %178 : vector<16x64xf32>
      %180 = arith.mulf %173, %163 : vector<16x64xf32>
      %181 = arith.addf %180, %179 : vector<16x64xf32>
      %182 = vector.extract_strided_slice %97 {offsets = [4, 0, 0], sizes = [1, 16, 1], strides = [1, 1, 1]} : vector<8x16x1xf32> to vector<1x16x1xf32>
      %183 = vector.shape_cast %182 : vector<1x16x1xf32> to vector<16x1xf32>
      %184 = vector.broadcast %183 : vector<16x1xf32> to vector<16x64xf32>
      %185 = arith.mulf %181, %184 : vector<16x64xf32>
      %cst_71 = arith.constant dense<0.000000e+00> : vector<64xf32>
      %186 = vector.multi_reduction <add>, %185, %cst_71 [0] : vector<16x64xf32> to vector<64xf32>
      %187 = vector.shape_cast %186 : vector<64xf32> to vector<1x64xf32>
      %188 = vector.extract_strided_slice %89 {offsets = [5, 0], sizes = [1, 64], strides = [1, 1]} : vector<8x64xf32> to vector<1x64xf32>
      %189 = vector.broadcast %188 : vector<1x64xf32> to vector<16x64xf32>
      %190 = arith.mulf %189, %62 : vector<16x64xf32>
      %191 = math.exp %190 : vector<16x64xf32>
      %192 = vector.extract_strided_slice %91 {offsets = [5, 0], sizes = [1, 64], strides = [1, 1]} : vector<8x64xf32> to vector<1x64xf32>
      %193 = vector.extract_strided_slice %94 {offsets = [5, 0, 0], sizes = [1, 16, 1], strides = [1, 1, 1]} : vector<8x16x1xf32> to vector<1x16x1xf32>
      %194 = vector.shape_cast %193 : vector<1x16x1xf32> to vector<16x1xf32>
      %195 = vector.broadcast %192 : vector<1x64xf32> to vector<16x64xf32>
      %196 = vector.broadcast %194 : vector<16x1xf32> to vector<16x64xf32>
      %197 = arith.mulf %195, %196 : vector<16x64xf32>
      %198 = arith.mulf %191, %181 : vector<16x64xf32>
      %199 = arith.addf %198, %197 : vector<16x64xf32>
      %200 = vector.extract_strided_slice %97 {offsets = [5, 0, 0], sizes = [1, 16, 1], strides = [1, 1, 1]} : vector<8x16x1xf32> to vector<1x16x1xf32>
      %201 = vector.shape_cast %200 : vector<1x16x1xf32> to vector<16x1xf32>
      %202 = vector.broadcast %201 : vector<16x1xf32> to vector<16x64xf32>
      %203 = arith.mulf %199, %202 : vector<16x64xf32>
      %cst_72 = arith.constant dense<0.000000e+00> : vector<64xf32>
      %204 = vector.multi_reduction <add>, %203, %cst_72 [0] : vector<16x64xf32> to vector<64xf32>
      %205 = vector.shape_cast %204 : vector<64xf32> to vector<1x64xf32>
      %206 = vector.extract_strided_slice %89 {offsets = [6, 0], sizes = [1, 64], strides = [1, 1]} : vector<8x64xf32> to vector<1x64xf32>
      %207 = vector.broadcast %206 : vector<1x64xf32> to vector<16x64xf32>
      %208 = arith.mulf %207, %62 : vector<16x64xf32>
      %209 = math.exp %208 : vector<16x64xf32>
      %210 = vector.extract_strided_slice %91 {offsets = [6, 0], sizes = [1, 64], strides = [1, 1]} : vector<8x64xf32> to vector<1x64xf32>
      %211 = vector.extract_strided_slice %94 {offsets = [6, 0, 0], sizes = [1, 16, 1], strides = [1, 1, 1]} : vector<8x16x1xf32> to vector<1x16x1xf32>
      %212 = vector.shape_cast %211 : vector<1x16x1xf32> to vector<16x1xf32>
      %213 = vector.broadcast %210 : vector<1x64xf32> to vector<16x64xf32>
      %214 = vector.broadcast %212 : vector<16x1xf32> to vector<16x64xf32>
      %215 = arith.mulf %213, %214 : vector<16x64xf32>
      %216 = arith.mulf %209, %199 : vector<16x64xf32>
      %217 = arith.addf %216, %215 : vector<16x64xf32>
      %218 = vector.extract_strided_slice %97 {offsets = [6, 0, 0], sizes = [1, 16, 1], strides = [1, 1, 1]} : vector<8x16x1xf32> to vector<1x16x1xf32>
      %219 = vector.shape_cast %218 : vector<1x16x1xf32> to vector<16x1xf32>
      %220 = vector.broadcast %219 : vector<16x1xf32> to vector<16x64xf32>
      %221 = arith.mulf %217, %220 : vector<16x64xf32>
      %cst_73 = arith.constant dense<0.000000e+00> : vector<64xf32>
      %222 = vector.multi_reduction <add>, %221, %cst_73 [0] : vector<16x64xf32> to vector<64xf32>
      %223 = vector.shape_cast %222 : vector<64xf32> to vector<1x64xf32>
      %224 = vector.extract_strided_slice %89 {offsets = [7, 0], sizes = [1, 64], strides = [1, 1]} : vector<8x64xf32> to vector<1x64xf32>
      %225 = vector.broadcast %224 : vector<1x64xf32> to vector<16x64xf32>
      %226 = arith.mulf %225, %62 : vector<16x64xf32>
      %227 = math.exp %226 : vector<16x64xf32>
      %228 = vector.extract_strided_slice %91 {offsets = [7, 0], sizes = [1, 64], strides = [1, 1]} : vector<8x64xf32> to vector<1x64xf32>
      %229 = vector.extract_strided_slice %94 {offsets = [7, 0, 0], sizes = [1, 16, 1], strides = [1, 1, 1]} : vector<8x16x1xf32> to vector<1x16x1xf32>
      %230 = vector.shape_cast %229 : vector<1x16x1xf32> to vector<16x1xf32>
      %231 = vector.broadcast %228 : vector<1x64xf32> to vector<16x64xf32>
      %232 = vector.broadcast %230 : vector<16x1xf32> to vector<16x64xf32>
      %233 = arith.mulf %231, %232 : vector<16x64xf32>
      %234 = arith.mulf %227, %217 : vector<16x64xf32>
      %235 = arith.addf %234, %233 : vector<16x64xf32>
      %236 = vector.extract_strided_slice %97 {offsets = [7, 0, 0], sizes = [1, 16, 1], strides = [1, 1, 1]} : vector<8x16x1xf32> to vector<1x16x1xf32>
      %237 = vector.shape_cast %236 : vector<1x16x1xf32> to vector<16x1xf32>
      %238 = vector.broadcast %237 : vector<16x1xf32> to vector<16x64xf32>
      %239 = arith.mulf %235, %238 : vector<16x64xf32>
      %cst_74 = arith.constant dense<0.000000e+00> : vector<64xf32>
      %240 = vector.multi_reduction <add>, %239, %cst_74 [0] : vector<16x64xf32> to vector<64xf32>
      %241 = vector.shape_cast %240 : vector<64xf32> to vector<1x64xf32>
      %242 = tpu.concatenate %115, %133, %151, %169, %187, %205, %223, %241 in 0 : vector<1x64xf32>, vector<1x64xf32>, vector<1x64xf32>, vector<1x64xf32>, vector<1x64xf32>, vector<1x64xf32>, vector<1x64xf32>, vector<1x64xf32> -> vector<8x64xf32>
      %243 = arith.index_cast %87 : i32 to index
      %c0_75 = arith.constant 0 : index
      %244 = vector.load %arg18[%243, %c0_75] : memref<16x64xf32, #tpu.memory_space<vmem>>, vector<8x64xf32>
      tpu.vector_store %arg18[%243, %c0_75], %242 {strides = array<i32>} : memref<16x64xf32, #tpu.memory_space<vmem>>, vector<8x64xf32>,
      scf.yield %235 : vector<16x64xf32>
    }
    %c2_i32_47 = arith.constant 2 : i32
    %c0_48 = arith.constant 0 : index
    %c0_49 = arith.constant 0 : index
    %66 = vector.load %arg12[%c0_48, %c0_49] : memref<16x64xf32, #tpu.memory_space<vmem>>, vector<16x64xf32>
    tpu.vector_store %arg12[%c0_48, %c0_49], %65 {strides = array<i32>} : memref<16x64xf32, #tpu.memory_space<vmem>>, vector<16x64xf32>,
    %c0_50 = arith.constant 0 : index
    %c0_51 = arith.constant 0 : index
    %67 = vector.load %arg18[%c0_50, %c0_51] : memref<16x64xf32, #tpu.memory_space<vmem>>, vector<16x64xf32>
    %c0_52 = arith.constant 0 : index
    %c0_53 = arith.constant 0 : index
    %68 = vector.load %arg9[%c0_52, %c0_53] : memref<1x64xf32, #tpu.memory_space<vmem>>, vector<1x64xf32>
    %69 = vector.broadcast %68 : vector<1x64xf32> to vector<16x64xf32>
    %70 = arith.mulf %37, %69 : vector<16x64xf32>
    %71 = arith.addf %67, %70 : vector<16x64xf32>
    %cst_54 = arith.constant 0.000000e+00 : f32
    %72 = vector.broadcast %cst_54 : f32 to vector<16x64xf32>
    %73 = arith.subf %72, %8 : vector<16x64xf32>
    %74 = math.exp %73 : vector<16x64xf32>
    %cst_55 = arith.constant 1.000000e+00 : f32
    %75 = vector.broadcast %cst_55 : f32 to vector<16x64xf32>
    %76 = arith.addf %75, %74 : vector<16x64xf32>
    %cst_56 = arith.constant 1.000000e+00 : f32
    %77 = vector.broadcast %cst_56 : f32 to vector<16x64xf32>
    %78 = arith.divf %77, %76 : vector<16x64xf32>
    %79 = arith.mulf %8, %78 : vector<16x64xf32>
    %80 = arith.mulf %71, %79 : vector<16x64xf32>
    %81 = arith.truncf %80 : vector<16x64xf32> to vector<16x64xbf16>
    %c0_57 = arith.constant 0 : index
    %c0_58 = arith.constant 0 : index
    %82 = vector.load %arg10[%c0_57, %c0_58] : memref<64x32xbf16, #tpu.memory_space<vmem>>, vector<64x32xbf16>
    %cst_59 = arith.constant dense<0.000000e+00> : vector<16x32xf32>
    %83 = tpu.matmul %81, %82, %cst_59 {dimension_numbers = #tpu.dot_dimension_numbers<[1], [0], [0], [1], [0, 0, 1, 1], [], []>} : vector<16x64xbf16>, vector<64x32xbf16>, vector<16x32xf32> -> vector<16x32xf32>
    %84 = vector.shape_cast %83 : vector<16x32xf32> to vector<1x16x32xf32>
    %c0_60 = arith.constant 0 : index
    %c0_61 = arith.constant 0 : index
    %c0_62 = arith.constant 0 : index
    %85 = vector.load %arg11[%c0_60, %c0_61, %c0_62] : memref<1x16x32xf32, #tpu.memory_space<vmem>>, vector<1x16x32xf32>
    tpu.vector_store %arg11[%c0_60, %c0_61, %c0_62], %84 {strides = array<i32>} : memref<1x16x32xf32, #tpu.memory_space<vmem>>, vector<1x16x32xf32>,
    return
  }
  func.func @transform_0(%arg0: i32, %arg1: i32) -> (i32, i32, i32) {
    %c0_i32 = arith.constant 0 : i32
    %c0_i32_0 = arith.constant 0 : i32
    return %arg0, %arg1, %c0_i32 : i32, i32, i32
  }
  func.func @transform_1(%arg0: i32, %arg1: i32) -> (i32, i32) {
    %c0_i32 = arith.constant 0 : i32
    %c0_i32_0 = arith.constant 0 : i32
    %c0_i32_1 = arith.constant 0 : i32
    return %c0_i32, %c0_i32_0 : i32, i32
  }
  func.func @transform_2(%arg0: i32, %arg1: i32) -> (i32, i32) {
    %c0_i32 = arith.constant 0 : i32
    %c0_i32_0 = arith.constant 0 : i32
    %c0_i32_1 = arith.constant 0 : i32
    return %c0_i32, %c0_i32_0 : i32, i32
  }
  func.func @transform_3(%arg0: i32, %arg1: i32) -> (i32, i32) {
    %c0_i32 = arith.constant 0 : i32
    %c0_i32_0 = arith.constant 0 : i32
    %c0_i32_1 = arith.constant 0 : i32
    return %c0_i32, %c0_i32_0 : i32, i32
  }
  func.func @transform_4(%arg0: i32, %arg1: i32) -> (i32, i32) {
    %c0_i32 = arith.constant 0 : i32
    %c0_i32_0 = arith.constant 0 : i32
    %c0_i32_1 = arith.constant 0 : i32
    return %c0_i32, %c0_i32_0 : i32, i32
  }
  func.func @transform_5(%arg0: i32, %arg1: i32) -> (i32, i32) {
    %c0_i32 = arith.constant 0 : i32
    %c0_i32_0 = arith.constant 0 : i32
    %c0_i32_1 = arith.constant 0 : i32
    return %c0_i32, %c0_i32_0 : i32, i32
  }
  func.func @transform_6(%arg0: i32, %arg1: i32) -> (i32, i32) {
    %c0_i32 = arith.constant 0 : i32
    %c0_i32_0 = arith.constant 0 : i32
    %c0_i32_1 = arith.constant 0 : i32
    return %c0_i32, %c0_i32_0 : i32, i32
  }
  func.func @transform_7(%arg0: i32, %arg1: i32) -> (i32, i32) {
    %c0_i32 = arith.constant 0 : i32
    %c0_i32_0 = arith.constant 0 : i32
    %c0_i32_1 = arith.constant 0 : i32
    return %c0_i32, %c0_i32_0 : i32, i32
  }
  func.func @transform_8(%arg0: i32, %arg1: i32) -> (i32, i32) {
    %c0_i32 = arith.constant 0 : i32
    %c0_i32_0 = arith.constant 0 : i32
    %c0_i32_1 = arith.constant 0 : i32
    return %c0_i32, %c0_i32_0 : i32, i32
  }
  func.func @transform_9(%arg0: i32, %arg1: i32) -> (i32, i32, i32) {
    %c0_i32 = arith.constant 0 : i32
    %c0_i32_0 = arith.constant 0 : i32
    return %arg0, %arg1, %c0_i32 : i32, i32, i32
  }
}

</mosaic_0001>

<bundles_post_ra>
// kernel: tpu_custom_call.1
= control target key start
LH: loop header
LB: loop body
LE: loop exit
PB: predicated region body
PF: predicated region fallthrough
CT: control target
= control target key end

     0   :  { %14 = vsyncpa [#allocation10], 0  ;;  %s2589_s0 = inlined_call_operand.vmem [shape: bf16[2,32,32], index: 0, kind: input, shape index: {}]   ;;  %s2590_s1 = inlined_call_operand.vmem [shape: bf16[32,128], index: 1, kind: input, shape index: {}]   ;;  %s2591_s2 = inlined_call_operand.hbm [shape: f32[4,64], index: 2, kind: input, shape index: {}]   ;;  %s2592_s3 = inlined_call_operand.hbm [shape: bf16[64,384], index: 3, kind: input, shape index: {}]   ;;  %s2593_s4 = inlined_call_operand.vmem [shape: bf16[2,64], index: 4, kind: input, shape index: {}]   ;;  %s2594_s5 = inlined_call_operand.vmem [shape: f32[1,64], index: 5, kind: input, shape index: {}]   ;;  %s2595_s6 = inlined_call_operand.hbm [shape: f32[16,64], index: 6, kind: input, shape index: {}]   ;;  %s2596_s7 = inlined_call_operand.vmem [shape: f32[1,64], index: 7, kind: input, shape index: {}]   ;;  %s2597_s8 = inlined_call_operand.vmem [shape: bf16[64,32], index: 8, kind: input, shape index: {}]   ;;  %s2598_s9 = inlined_call_operand.hbm [shape: f32[2,32,32], index: 9, kind: output, shape index: {}]  }
   0x1   :  { %15 = vsyncpa [#allocation13], 0 }
   0x2   :  { %16 = vsyncpa [#allocation11], 0 }
   0x3   :  { %18 = vsyncpa [#allocation11 + $0x1], 0  ;;  %s2112_s30 = smov 0   ;;  %s2114_s10 = smov 0  }
   0x4   :  { %s2116_s11 = smov 0   ;;  %s2118_s12 = smov 0  }
   0x5   :  { %s2120_s13 = smov 0   ;;  %s2122_s14 = smov 0  }
   0x6   :  { %s2124_s15 = smov 0   ;;  %s2126_s16 = smov 0  }
   0x7 LB: > { %2608 = sst [smem:[#allocation19_spill]] %s2013_s11  ;;  %s1521_s17 = sadd.s32 4294967295, %s2033_s16   ;;  %s2033_s16 = sphi %s2126_s16, %s24_s16   ;;  %s2029_s15 = sphi %s2124_s15, %s2632_s15   ;;  %s2025_s14 = sphi %s2122_s14, %s2631_s14   ;;  %s2021_s13 = sphi %s2120_s13, %s2630_s13   ;;  %s2017_s12 = sphi %s2118_s12, %s2629_s12   ;;  %s2013_s11 = sphi %s2116_s11, %s2628_s11   ;;  %s2009_s10 = sphi %s2114_s10, %s2634_s10   ;;  %s2005_s30 = sphi %s2112_s30, %s2633_s30  }
   0x8   : > { %2609 = sst [smem:[#allocation20_spill]] %s2025_s14  ;;  %s1522_s18 = sadd.s32 4294967294, %s2033_s16  }
   0x9   : > { %2610 = sst [smem:[#allocation21_spill]] %s2029_s15  ;;  %s33_s19 = sadd.s32 1, %s2025_s14 }
   0xa   : > { %s36_s20 = sadd.s32 1, %s2029_s15  ;;  %p34_p0 = scmp.ge.s32.totalorder %s33_s19, 2 }
   0xb   : > { %s241_s21 = sadd.s32 1, %s2013_s11  ;;  %p251_p1 = scmp.ne.s32.totalorder %s2013_s11, %s2009_s10 }
   0xc   : > { %p252_p2 = scmp.eq.s32.totalorder %s1521_s17, 3  ;;  %s2636_s19 = smov (%p34_p0, %s33_s19), 0 }
   0xd   : > { %2611 = sst [smem:[#allocation22_spill]] %s2636_s19  ;;  %s2638_s20 = smov (!%p34_p0, %s36_s20), %s2029_s15 }
   0xe   : > { %s237_s22 = ssub.s32 %s2025_s14, %s2636_s19  ;;  %p2164_p3 = por %p252_p2, %p251_p1 }
   0xf   : > { %p38_p4 = scmp.ge.s32.totalorder %s2638_s20, 2  ;;  %p257_p5 = scmp.ne.s32.totalorder %s2009_s10, %s2005_s30 }
  0x10   : > { %s2612_s23 = scalar_select %p2164_p3, 1, 0 }
  0x11   : > { %p258_p6 = scmp.eq.s32.totalorder %s1522_s18, 3  ;;  %p1523_p7 = scmp.ge.s32.totalorder %s2033_s16, 1 }
  0x12   : > { %s2640_s20 = smov (%p38_p4, %s2638_s20), 0  ;;  %p265_p9 = scmp.lt.s32.totalorder %s2033_s16, 5 }
  0x13   : > { %2613 = sst [smem:[#allocation23_spill]] %s2640_s20  ;;  %p2173_p8 = por %p258_p6, %p257_p5 }
  0x14   : > { %s236_s25 = ssub.s32 %s2029_s15, %s2640_s20  ;;  %p2180_p10 = pnand %p1523_p7, %p265_p9 }
  0x15   : > { %s2614_s24 = scalar_select %p2173_p8, 1, 0 }
  0x16   : > { %s238_s26 = sor.u32 %s237_s22, %s236_s25  ;;  %p2184_p12 = scmp.eq.s32.totalorder %s1521_s17, 0 }
  0x17   : > { %s2615_s27 = scalar_select %p2180_p10, 1, 0 }
  0x18   : > { %p239_p11 = scmp.eq.s32.totalorder %s238_s26, 0  ;;  %p1641_p13 = pneg %p2180_p10 }
  0x19   : > { %s2616_s28 = scalar_select %p2184_p12, 1, 0 }
  0x1a   : > { %s2191_s29 = scalar_select %p239_p11, %s2013_s11, %s241_s21  }
  0x1b   : > { %p2195_p0 = pnand %p2184_p12, %p1641_p13  ;;  %s2047_s22 = smov [#allocation12]  }
  0x1c   : > { %2617 = sst [smem:[#allocation24_spill]] %s2191_s29  ;;  %s291_s25 = sshll.u32 %s2047_s22, 4  ;;  %s292_s25 = int_to_ptr.vmem [resolvable:$true] %s291_s25 }
  0x1d   : > { %p1845_p1 = pneg %p2195_p0  ;;  %s1854_s17 = scalar_lea.vmem %s292_s25, 1536 }
  0x1e   : > { %p1855_p2 = scmp.ne.s32.totalorder %s292_s25, %s1854_s17  ;;  %p1862_p6 = scmp.lt.s32.totalorder %s292_s25, %s292_s25 }
  0x1f   : > { %p1863_p7 = scmp.lt.s32.totalorder %s1854_s17, %s1854_s17 }
  0x20   : > { %p1857_p4 = pnand %p1855_p2, %p1845_p1 }
  0x21   : > { %p1864_p9 = por %p1863_p7, %p1862_p6 }
  0x22   : > { %p1858_p5 = pneg %p1857_p4 }
  0x24   : > { %p1865_p11 = pnand %p1864_p9, %p1858_p5 }
  0x26   : > { %1868 = shalt.err (!%p1865_p11)
}
  0x27   : > { %s2048_s21 = smov 192   ;;  %s2049_s26 = smov 12  }
  0x28   : > { %1647 = dma.hbm_to_vmem [thread:$0]  (!%p2195_p0), %s2592_s3, 1536, %s292_s25, [#allocation13], %s2048_s21, %s2048_s21, %s2049_s26  }
  0x29   : > { %s2050_s19 = smov [#allocation9]   ;;  %s2051_s14 = smov [#allocation14]  }
  0x2a   : > { %s281_s15 = sshll.u32 %s2050_s19, 4  ;;  %s310_s29 = sshll.u32 %s2051_s14, 4  ;;  %s282_s15 = int_to_ptr.vmem [resolvable:$true] %s281_s15  ;;  %s311_s29 = int_to_ptr.vmem [resolvable:$true] %s310_s29 }
  0x2b   : > { %s1880_s11 = scalar_lea.vmem %s282_s15, 64  ;;  %p1888_p5 = scmp.lt.s32.totalorder %s282_s15, %s282_s15 }
  0x2c   : > { %p1881_p13 = scmp.ne.s32.totalorder %s282_s15, %s1880_s11  ;;  %p1889_p6 = scmp.lt.s32.totalorder %s1880_s11, %s1880_s11 }
  0x2e   : > { %p1883_p2 = pnand %p1881_p13, %p1845_p1  ;;  %p1890_p7 = por %p1889_p6, %p1888_p5 }
  0x30   : > { %p1884_p4 = pneg %p1883_p2 }
  0x32   : > { %p1891_p9 = pnand %p1890_p7, %p1884_p4 }
  0x34   : > { %1894 = shalt.err (!%p1891_p9)
}
  0x35   : > { %1644 = dma.hbm_to_vmem [thread:$0]  (!%p2195_p0), %s2591_s2, 64, %s282_s15, [#allocation10]  }
  0x36   : > { %s1906_s14 = scalar_lea.vmem %s311_s29, 256  ;;  %p1914_p13 = scmp.lt.s32.totalorder %s311_s29, %s311_s29 }
  0x37   : > { %p1907_p11 = scmp.ne.s32.totalorder %s311_s29, %s1906_s14  ;;  %p1915_p2 = scmp.lt.s32.totalorder %s1906_s14, %s1906_s14 }
  0x39   : > { %p1909_p8 = pnand %p1907_p11, %p1845_p1  ;;  %p1916_p12 = por %p1915_p2, %p1914_p13 }
  0x3b   : > { %p1910_p3 = pneg %p1909_p8 }
  0x3d   : > { %p1917_p10 = pnand %p1916_p12, %p1910_p3 }
  0x3f   : > { %1920 = shalt.err (!%p1917_p10)
}
  0x40   : > { %s2052_s11 = smov 128   ;;  %s2053_s19 = smov 8  }
  0x41   : > { %1650 = dma.hbm_to_vmem [thread:$0]  (!%p2195_p0), %s2595_s6, 256, %s311_s29, [#allocation13], %s2052_s11, %s2052_s11, %s2053_s19  }
  0x42   : > { %p2619_p4 = scmp.ne.s32.totalorder %s2615_s27, 0 }
  0x43   : > { %p2620_p5 = scmp.ne.s32.totalorder (!%p2619_p4), %s2616_s28, 0 }
  0x44   : > { %345 = sbr.rel (%p2619_p4) target bundleno = 1333 (0x535), region = 56 }
  0x49   : > { %1992 = dma.done.wait (%p2620_p5), [#allocation10], 64  }
  0x4a   : > { %1994 = vsyncadd (%p2620_p5), [#allocation10], 4294967232 }
  0x4b   : > { %1996 = dma.done.wait (%p2620_p5), [#allocation13], 1792  }
  0x4c   : > { %1998 = vsyncadd (%p2620_p5), [#allocation13], 4294965504  ;;  %s390_s15 = sand.u32 1, %s2009_s10   ;;  %s2237_s27 = sshll.u32 %s2017_s12, 1 }
  0x4d   : > { %s1532_s29 = sshll.u32 %s390_s15, 4  ;;  %p394_p3 = scmp.lt.s32.totalorder %s2021_s13, 1 }
  0x4e   : > { %p396_p8 = scmp.lt.s32.totalorder %s2237_s27, 3  ;;  %s2248_s19 = scalar_lea.vmem [#allocation15], %s1532_s29 }
  0x4f   : > { %s395_s18 = scalar_select %p394_p3, %s2021_s13, 1 }
  0x50   : > { %s397_s26 = scalar_select %p396_p8, %s2237_s27, 3 }
  0x51   : > { %s1534_s22 = sshll.u32 %s395_s18, 2  ;;  %p1536_p10 = scmp.ne.s32.totalorder %s2017_s12, 0 }
  0x52   : > { %s399_s20 = sadd.s32 %s1534_s22, %s397_s26 }
  0x53   : > { %s1535_s28 = sshll.u32 %s399_s20, 2  ;;  %408 = sbr.rel (%p1536_p10) target bundleno = 91 (0x5b), region = 72 }
  0x54   : > { %s401_s11 = scalar_lea.vmem %s2589_s0, %s1535_s28 }
  0x58   : > { %vm409_vm0 = vcmask 523264   ;;  %vm412_vm1 = vcmask 518144   ;;  %v2054_v0 = vmov 0.0  }
  0x59   : > { %410 = vst.msk [vmem:[#allocation2] sm:$0xff] %vm409_vm0, %v2054_v0  ;;  %411 = vst.msk [vmem:[#allocation2 + $0x8] sm:$0xff] %vm409_vm0, %v2054_v0 }
  0x5a   : > { %413 = vst.msk [vmem:[#allocation3] sm:$0x7] %vm412_vm1, %v2054_v0 }
  0x5b PF: > { %v1764_v1 = vld [vmem:[%s2590_s1 + $0x8] sm:$0xff]   ;;  %v2055_v2 = vmov 0.0   ;;  %v1765_v3 = vld [vmem:[%s2590_s1] sm:$0xff]   ;;  %vm2056_vm2 = vmmov 0   ;;  %vm437_vm3 = vcmask 261120   ;;  %v2057_v17 = vmov 0  }
  0x5c   : > { %1589 = vmatprep.subr.bf16.mxu1 %v2055_v2  ;;  %1597 = vmatprep.subr.bf16.mxu0 %v2055_v2  ;;  %v1766_v4 = vld [vmem:[%s401_s11] sm:$0xff]   ;;  %v1769_v5 = vld [vmem:[#allocation12 + $0x4c] ss:$12 sps:$4 sm:$0xff]   ;;  %v1770_v7 = vld [vmem:[#allocation12 + $0x50] ss:$12 sps:$4 sm:$0xff]   ;;  %vm482_vm4 = vcmask 523264  }
  0x5d   : > { %1590 = vmatpush3.bf16.msra.mxu1 %v1764_v1  ;;  %1593 = vmatprep.mubr.msk.bf16.mxu1 %vm2056_vm2, %v2055_v2  ;;  %v1767_v6 = vld [vmem:[#allocation12 + $0x48] ss:$12 sps:$4 sm:$0xff]   ;;  %v1771_v9 = vld [vmem:[#allocation12 + $0x30] ss:$12 sps:$4 sm:$0xff]   ;;  %v1774_v10 = vld [vmem:[#allocation12 + $0x38] ss:$12 sps:$4 sm:$0xff]  }
  0x5e   : > { %1591 = vmatprep.subr.bf16.mxu1 %v2055_v2  ;;  %1605 = vmatprep.mubr.msk.bf16.mxu0 %vm2056_vm2, %v2055_v2  ;;  %v1773_v8 = vld [vmem:[#allocation12 + $0x34] ss:$12 sps:$4 sm:$0xff]   ;;  %v1777_v11 = vld [vmem:[#allocation12 + $0x1c] ss:$12 sps:$4 sm:$0xff]   ;;  %v1775_v12 = vld [vmem:[#allocation12 + $0x18] ss:$12 sps:$4 sm:$0xff]  }
  0x5f   : > { %1598 = vmatpush3.bf16.msra.mxu0 %v1770_v7  ;;  %v1778_v13 = vld [vmem:[#allocation12 + $0x20] ss:$12 sps:$4 sm:$0xff]   ;;  %v1781_v14 = vld [vmem:[#allocation12 + $0x4] ss:$12 sps:$4 sm:$0xff]   ;;  %v1782_v16 = vld [vmem:[#allocation12 + $0x8] ss:$12 sps:$4 sm:$0xff]  }
  0x60   : > { %1599 = vmatprep.subr.bf16.mxu0 %v2055_v2  ;;  %v1779_v15 = vld [vmem:[#allocation12] ss:$12 sps:$4 sm:$0xff]   ;;  %v1541_v21 = vld [vmem:[#allocation9 + $0x3] ss:$0 sm:$0xff]  ;;  %v1542_v22 = vld [vmem:[#allocation9] ss:$0 sm:$0xff] }
  0x61   : > { %1592 = vmatpush3.bf16.msra.mxu1 %v1765_v3  ;;  %v1543_v26 = vld [vmem:[#allocation9 + $0x1] ss:$0 sm:$0xff]  ;;  %v1544_v30 = vld [vmem:[#allocation9 + $0x2] ss:$0 sm:$0xff]  ;;  %vm526_vm5 = vcmask 518144   ;;  %vm728_vm6 = vcmask 1040384  }
  0x62   : > { %634 = vmatprep.subr.bf16.mxu1 %v1769_v5  ;;  %v716_v57 = vld [vmem:[%s2593_s4] sm:$0x1]  ;;  %vm710_vm7 = vcmask 130048   ;;  %vm724_vm8 = vcmask 15360   ;;  %s2310_s28 = smov 0  }
  0x63   : > { %1600 = vmatpush3.bf16.msra.mxu0 %v1774_v10  ;;  %v730_v61 = vsel %vm728_vm6, %v716_v57, 0  ;;  %v795_v10 = vld [vmem:[#allocation2] sm:$0xff]  }
  0x64   : > { %1594 = vmatmul.mubr.msk.bf16.vlgmr.msra.gmra.mxu1 %vm437_vm3, %v1766_v4  ;;  %1601 = vmatprep.subr.bf16.mxu0 %v2055_v2 }
  0x65   : > { %635 = vmatpush1.bf16.msra.mxu1 %v1767_v6  ;;  %658 = vmatprep.mubr.bf16.mxu1 %v2057_v17 }
  0x66   : > { %636 = vmatprep.subr.bf16.mxu1 %v1773_v8  ;;  %v2293_v8 = vld [vmem:[#allocation14] sm:$0xff] }
  0x67   : > { %1602 = vmatpush3.bf16.msra.mxu0 %v1778_v13 }
  0x68   : > { %1603 = vmatprep.subr.bf16.mxu0 %v2055_v2 }
  0x69   : > { %637 = vmatpush1.bf16.msra.mxu1 %v1771_v9  ;;  %v2295_v9 = vld [vmem:[#allocation14 + $0x8] sm:$0xff] }
  0x6a   : > { %638 = vmatprep.subr.bf16.mxu1 %v1777_v11  ;;  %v796_v11 = vld [vmem:[#allocation2 + $0x8] sm:$0xff]  }
  0x6b   : > { %1604 = vmatpush3.bf16.msra.mxu0 %v1782_v16 }
  0x6d   : > { %639 = vmatpush1.bf16.msra.mxu1 %v1775_v12  ;;  %v1559_v12 = vld [vmem:[%s2594_s5] ss:$0 sm:$0xff] }
  0x6e   : > { %640 = vmatprep.subr.bf16.mxu1 %v1781_v14 }
  0x71   : > { %641 = vmatpush1.bf16.msra.mxu1 %v1779_v15 }
  0x72   : > { %1609 = vmatprep.subr.bf16.mxu1 %v2055_v2 }
 0x124   : > { %v2269_v18 = vpop.f32.mrf.mxu1 }
 0x125   : > { %483 = vst.msk [vmem:[#allocation3 + $0x3] sm:$0xff] %vm482_vm4, %v2269_v18  ;;  %v490_v27 = vmul.f32 %v1541_v21, %v2269_v18 }
 0x126   : > { %v1595_v19 = vpop.f32.mrf.mxu1 }
 0x128   : > { %v2273_v20 = vpop.f32.mrf.mxu1 }
 0x129   : > { %484 = vst.msk [vmem:[#allocation3 + $0xb] sm:$0xff] %vm482_vm4, %v2273_v20  ;;  %v491_v37 = vmul.f32 %v1541_v21, %v2273_v20 }
 0x12a   : > { %v1596_v23 = vpop.f32.mrf.mxu1 }
 0x12c   : > { %v492_v24 = vld [vmem:[#allocation3] sm:$0xff] }
 0x12d   : > { %v503_v25 = vld [vmem:[#allocation3 + $0x1] sm:$0xff]  ;;  %v499_v28 = vmul.f32 %v1542_v22, %v492_v24 }
 0x12e   : > { %v514_v29 = vld [vmem:[#allocation3 + $0x2] sm:$0xff]  ;;  %v510_v32 = vmul.f32 %v1543_v26, %v503_v25 }
 0x12f   : > { %v501_v31 = vadd.f32 %v499_v28, %v490_v27  ;;  %v521_v36 = vmul.f32 %v1544_v30, %v514_v29 }
 0x130   : > { %v493_v33 = vld [vmem:[#allocation3 + $0x8] sm:$0xff]  ;;  %v525_v39 = vld [vmem:[#allocation3 + $0x10] sm:$0x7] }
 0x131   : > { %v504_v34 = vld [vmem:[#allocation3 + $0x9] sm:$0xff]  ;;  %v512_v35 = vadd.f32 %v510_v32, %v501_v31  ;;  %v500_v38 = vmul.f32 %v1542_v22, %v493_v33  ;;  %527 = vst.msk [vmem:[#allocation3] sm:$0x7] %vm526_vm5, %v525_v39 }
 0x132   : > { %v515_v40 = vld [vmem:[#allocation3 + $0xa] sm:$0xff]  ;;  %v511_v43 = vmul.f32 %v1543_v26, %v504_v34 }
 0x133   : > { %v523_v41 = vadd.f32 %v521_v36, %v512_v35  ;;  %v502_v42 = vadd.f32 %v500_v38, %v491_v37  ;;  %v522_v46 = vmul.f32 %v1544_v30, %v515_v40 }
 0x135   : > { %v528_v44 = vsub.f32 0.0, %v523_v41  ;;  %v513_v45 = vadd.f32 %v511_v43, %v502_v42 }
 0x137   : > { %v530_v47 = vmul.f32 1.442695, %v528_v44  ;;  %v524_v48 = vadd.f32 %v522_v46, %v513_v45 }
 0x139   : > { %1783 = vpow2.f32 %v530_v47  ;;  %v529_v49 = vsub.f32 0.0, %v524_v48 }
 0x13b   : > { %v532_v50 = vmul.f32 1.442695, %v529_v49 }
 0x13d   : > { %1785 = vpow2.f32 %v532_v50 }
 0x146   : > { %v1784_v51 = vpop.eup %1783 }
 0x147   : > { %v534_v52 = vadd.f32 1.0, %v1784_v51 }
 0x149   : > { %1787 = vrcp.f32 %v534_v52 }
 0x14a   : > { %v1786_v53 = vpop.eup %1785 }
 0x14b   : > { %v535_v54 = vadd.f32 1.0, %v1786_v53 }
 0x14d   : > { %1789 = vrcp.f32 %v535_v54 }
 0x156   : > { %v1788_v55 = vpop.eup %1787 }
 0x157   : > { %v2282_v58 = vmul.f32 %v1788_v55, %v523_v41 }
 0x15a   : > { %v1790_v56 = vpop.eup %1789 }
 0x15b   : > { %v2284_v59 = vmul.f32 %v1790_v56, %v524_v48 }
 0x15d   : > { %v542_v60 = vpack.c.bf16 %v2284_v59, %v2282_v58 }
 0x15f   : > { %1557 = vmatmul.mubr.msk.bf16.vlgmr.msra.gmra.mxu1 %vm482_vm4, %v542_v60  ;;  %1606 = vmatmul.mubr.msk.bf16.vlgmr.msra.gmra.mxu0 %vm482_vm4, %v542_v60 }
 0x160   : > { %1610 = vmatpush3.bf16.msra.mxu1 %v730_v61  ;;  %1611 = vmatprep.mubr.msk.bf16.mxu1 %vm2056_vm2, %v2055_v2 }
 0x21f   : > { %v660_v62 = vpop.f32.mrf.mxu1  ;;  %v703_v63 = vpop.f32.mrf.mxu0 }
 0x220   : > { %713 = vst.msk [vmem:[#allocation7] sm:$0xff] %vm710_vm7, %v703_v63 }
 0x221   : > { %v662_v0 = vpop.f32.mrf.mxu1  ;;  %v1607_v1 = vpop.f32.mrf.mxu0 }
 0x222   : > { %711 = vst.msk [vmem:[#allocation6] sm:$0xff] %vm710_vm7, %v662_v0 }
 0x223   : > { %v664_v3 = vpop.f32.mrf.mxu1  ;;  %v706_v4 = vpop.f32.mrf.mxu0 }
 0x224   : > { %v715_v5 = vpack.c.bf16 %v664_v3, %v660_v62  ;;  %714 = vst.msk [vmem:[#allocation7 + $0x8] sm:$0xff] %vm710_vm7, %v706_v4 }
 0x225   : > { %v666_v6 = vpop.f32.mrf.mxu1  ;;  %v1608_v7 = vpop.f32.mrf.mxu0 }
 0x226   : > { %712 = vst.msk [vmem:[#allocation6 + $0x8] sm:$0xff] %vm710_vm7, %v666_v6  ;;  %1612 = vmatmul.mubr.msk.bf16.vlgmr.msra.gmra.mxu1 %vm724_vm8, %v715_v5 }
 0x2e6   : > { %v766_v13 = vpop.f32.mrf.mxu1 }
 0x2e7   : > { %v767_v14 = vadd.f32 %v1559_v12, %v766_v13 }
 0x2e8   : > { %v1613_v15 = vpop.f32.mrf.mxu1 }
 0x2e9   : > { %v775_v16 = vmul.f32 1.442695, %v767_v14  ;;  %vm773_vm9 = vcmp.gt.f32.partialorder %v767_v14, 20.0 }
 0x2ea   : > { %v769_v17 = vpop.f32.mrf.mxu1 }
 0x2eb   : > { %1791 = vpow2.f32 %v775_v16  ;;  %v770_v19 = vadd.f32 %v1559_v12, %v769_v17 }
 0x2ec   : > { %v1614_v21 = vpop.f32.mrf.mxu1 }
 0x2ed   : > { %v777_v22 = vmul.f32 1.442695, %v770_v19  ;;  %vm774_vm10 = vcmp.gt.f32.partialorder %v770_v19, 20.0 }
 0x2ef   : > { %1793 = vpow2.f32 %v777_v22 }
 0x2f8   : > { %v1792_v23 = vpop.eup %1791 }
 0x2f9   : > { %v779_v24 = vadd.f32 1.0, %v1792_v23 }
 0x2fb   : > { %1795 = vlog2.f32 %v779_v24 }
 0x2fc   : > { %v1794_v25 = vpop.eup %1793 }
 0x2fd   : > { %v780_v26 = vadd.f32 1.0, %v1794_v25 }
 0x2ff   : > { %1797 = vlog2.f32 %v780_v26 }
 0x308   : > { %v1796_v27 = vpop.eup %1795 }
 0x309   : > { %v782_v28 = vmul.f32 0.6931472, %v1796_v27 }
 0x30b   : > { %v785_v29 = vsel %vm773_vm9, %v767_v14, %v782_v28 }
 0x30c   : > { %v1798_v30 = vpop.eup %1797  ;;  %787 = vst.msk [vmem:[#allocation4] sm:$0xff] %vm482_vm4, %v785_v29  ;;  %v789_v31 = vmul.f32 %v785_v29, %v2282_v58 }
 0x30d   : > { %v784_v32 = vmul.f32 0.6931472, %v1798_v30 }
 0x30e   : > { %791 = vst.msk [vmem:[#allocation5] sm:$0xff] %vm482_vm4, %v789_v31 }
 0x30f   : > { %v786_v33 = vsel %vm774_vm10, %v770_v19, %v784_v32 }
 0x310   : > { %788 = vst.msk [vmem:[#allocation4 + $0x8] sm:$0xff] %vm482_vm4, %v786_v33  ;;  %v790_v34 = vmul.f32 %v786_v33, %v2284_v59 }
 0x312   : > { %792 = vst.msk [vmem:[#allocation5 + $0x8] sm:$0xff] %vm482_vm4, %v790_v34 }
 0x313 LB: >> { %v812_v35 = vlaneseq  ;;  %s2322_s25 = sshll.u32 %s2045_s28, 3  ;;  %vm1239_vm11 = vcmask 1041408   ;;  %vm1241_vm12 = vcmask 1042432   ;;  %vm1243_vm13 = vcmask 1043456   ;;  %s802_s28 = sadd.s32 1, %s2045_s28   ;;  %s2045_s28 = sphi %s2310_s28, %s802_s28   ;;  %v2041_v10 = vphi %v795_v10, %v2624_v10   ;;  %v2037_v11 = vphi %v796_v11, %v2623_v11  }
 0x314   : >> { %s810_s14 = scalar_lea.vmem [#allocation6], %s2322_s25  ;;  %s900_s11 = scalar_lea.vmem [#allocation7], %s2322_s25  ;;  %vm1245_vm14 = vcmask 1044480   ;;  %vm1247_vm15 = vcmask 1045504   ;;  %vm1249_vm0 = vcmask 1046528  }
 0x315   : >> { %v813_v36 = vshrl.u32 %v812_v35, 7  ;;  %v811_v37 = vld [vmem:[%s810_s14] sm:$0xff]  ;;  %s806_s17 = scalar_lea.vmem [#allocation4], %s2322_s25  ;;  %s808_s21 = scalar_lea.vmem [#allocation5], %s2322_s25 }
 0x316   : >> { %v901_v52 = vld [vmem:[%s900_s11] sm:$0xff]  ;;  %s1251_s29 = scalar_lea.vmem [#allocation8], %s2322_s25  ;;  %p799_p12 = scmp.ge.s32.totalorder %s802_s28, 2  }
 0x317   : >> { %v2325_v38 = vsub.s32 1, %v813_v36  ;;  %v2327_v39 = vsub.s32 0, %v813_v36  ;;  %v2331_v42 = vsub.s32 2, %v813_v36  ;;  %v2334_v44 = vsub.s32 3, %v813_v36  ;;  %v807_v1 = vld [vmem:[%s806_s17] sm:$0xff]  ;;  %1615 = vmatprep.subr.bf16.mxu0 (%p799_p12), %v2055_v2  ;;  %1623 = vmatprep.mubr.msk.bf16.mxu0 (%p799_p12), %vm2056_vm2, %v2055_v2  ;;  %s2058_s11 = smov (%p799_p12), 64  }
 0x318   : >> { %v2337_v46 = vsub.s32 4, %v813_v36  ;;  %v2340_v48 = vsub.s32 5, %v813_v36  ;;  %v2343_v50 = vsub.s32 6, %v813_v36  ;;  %v2350_v56 = vsub.s32 7, %v813_v36  ;;  %s1387_s26 = sshll.u32 (%p799_p12), %s2248_s19, 4  ;;  %p2625_p1 = scmp.ne.s32.totalorder (%p799_p12), %s2612_s23, 0  ;;  %s2532_s26 = int_to_ptr.vmem [resolvable:$true] %s1387_s26 }
 0x319   : >> { %v826_v40 = vrot.slane %v811_v37, %v2325_v38  ;;  %v815_v41 = vrot.slane %v811_v37, %v2327_v39  ;;  %v837_v43 = vrot.slane %v811_v37, %v2331_v42  ;;  %v848_v45 = vrot.slane %v811_v37, %v2334_v44  ;;  %v2375_v31 = vld [vmem:[%s808_s21] sm:$0xff]  ;;  %s2059_s25 = smov (%p799_p12), [#allocation15]  }
 0x31a   : >> { %v859_v47 = vrot.slane %v811_v37, %v2337_v46  ;;  %v870_v49 = vrot.slane %v811_v37, %v2340_v48  ;;  %v881_v51 = vrot.slane %v811_v37, %v2343_v50  ;;  %v905_v53 = vrot.slane %v901_v52, %v2327_v39  ;;  %s1925_s14 = sshll.u32 (%p799_p12), %s2059_s25, 4  ;;  %s1926_s14 = int_to_ptr.vmem [resolvable:$false] %s1925_s14 }
 0x31b   : >> { %828 = vbcast.lane.b32.xlu1 %v826_v40, 256  ;;  %817 = vbcast.lane.b32.xlu0 %v815_v41, 256  ;;  %v916_v54 = vrot.slane %v901_v52, %v2325_v38  ;;  %v927_v55 = vrot.slane %v901_v52, %v2331_v42  ;;  %v892_v57 = vrot.slane %v811_v37, %v2350_v56  ;;  %p1928_p9 = scmp.lt.s32.totalorder (%p799_p12), %s2532_s26, %s1926_s14 }
 0x31c   : >> { %v938_v60 = vrot.slane %v901_v52, %v2334_v44  ;;  %v949_v61 = vrot.slane %v901_v52, %v2337_v46  ;;  %v960_v62 = vrot.slane %v901_v52, %v2340_v48  ;;  %v971_v63 = vrot.slane %v901_v52, %v2343_v50 }
 0x31d   : >> { %v982_v0 = vrot.slane %v901_v52, %v2350_v56  ;;  %v993_v3 = vrot.slane %v807_v1, %v2327_v39  ;;  %v1024_v5 = vrot.slane %v807_v1, %v2325_v38  ;;  %v1055_v12 = vrot.slane %v807_v1, %v2331_v42 }
 0x31e   : >> { %v1086_v16 = vrot.slane %v807_v1, %v2334_v44  ;;  %v1117_v23 = vrot.slane %v807_v1, %v2337_v46  ;;  %v1148_v28 = vrot.slane %v807_v1, %v2340_v48  ;;  %v1179_v33 = vrot.slane %v807_v1, %v2343_v50 }
 0x31f   : >> { %832 = vbcast.lane.b32.xlu1 %v826_v40, 264  ;;  %821 = vbcast.lane.b32.xlu0 %v815_v41, 264  ;;  %v994_v4 = vmul.f32 %v993_v3, %v2293_v8  ;;  %v995_v6 = vmul.f32 %v993_v3, %v2295_v9  ;;  %v1025_v13 = vmul.f32 %v1024_v5, %v2293_v8 }
 0x320   : >> { %v1026_v15 = vmul.f32 %v1024_v5, %v2295_v9  ;;  %v1056_v19 = vmul.f32 %v1055_v12, %v2293_v8  ;;  %v1057_v22 = vmul.f32 %v1055_v12, %v2295_v9  ;;  %v1087_v25 = vmul.f32 %v1086_v16, %v2293_v8 }
 0x321   : >> { %v996_v7 = vmul.f32 1.442695, %v994_v4  ;;  %v998_v14 = vmul.f32 1.442695, %v995_v6  ;;  %v1027_v17 = vmul.f32 1.442695, %v1025_v13  ;;  %v1088_v27 = vmul.f32 %v1086_v16, %v2295_v9 }
 0x322   : >> { %v1029_v21 = vmul.f32 1.442695, %v1026_v15  ;;  %v1058_v24 = vmul.f32 1.442695, %v1056_v19  ;;  %v1060_v26 = vmul.f32 1.442695, %v1057_v22  ;;  %v1118_v30 = vmul.f32 %v1117_v23, %v2293_v8 }
 0x323   : >> { %843 = vbcast.lane.b32.xlu1 %v837_v43, 264  ;;  %839 = vbcast.lane.b32.xlu0 %v837_v43, 256  ;;  %1799 = vpow2.f32 %v996_v7  ;;  %v1089_v29 = vmul.f32 1.442695, %v1087_v25  ;;  %v1091_v34 = vmul.f32 1.442695, %v1088_v27  ;;  %v1119_v35 = vmul.f32 %v1117_v23, %v2295_v9 }
 0x324   : >> { %1801 = vpow2.f32 %v998_v14  ;;  %v1003_v36 = vrot.slane %v2375_v31, %v2327_v39  ;;  %v1120_v37 = vmul.f32 1.442695, %v1118_v30  ;;  %v1149_v40 = vmul.f32 %v1148_v28, %v2293_v8 }
 0x325   : >> { %1803 = vpow2.f32 %v1027_v17  ;;  %v1150_v43 = vmul.f32 %v1148_v28, %v2295_v9  ;;  %v1122_v52 = vmul.f32 1.442695, %v1119_v35  ;;  %v1034_v39 = vrot.slane %v2375_v31, %v2325_v38 }
 0x326   : >> { %1805 = vpow2.f32 %v1029_v21 }
 0x327   : >> { %854 = vbcast.lane.b32.xlu1 %v848_v45, 264  ;;  %850 = vbcast.lane.b32.xlu0 %v848_v45, 256  ;;  %1807 = vpow2.f32 %v1058_v24 }
 0x328   : >> { %1809 = vpow2.f32 %v1060_v26 }
 0x329   : >> { %1811 = vpow2.f32 %v1089_v29 }
 0x32a   : >> { %1813 = vpow2.f32 %v1091_v34 }
 0x32b   : >> { %865 = vbcast.lane.b32.xlu1 %v859_v47, 264  ;;  %861 = vbcast.lane.b32.xlu0 %v859_v47, 256  ;;  %v1210_v47 = vrot.slane %v807_v1, %v2350_v56  ;;  %1815 = vpow2.f32 %v1120_v37  ;;  %v1065_v1 = vrot.slane %v2375_v31, %v2331_v42  ;;  %v1096_v42 = vrot.slane %v2375_v31, %v2334_v44 }
 0x32c   : >> { %1817 = vpow2.f32 %v1122_v52  ;;  %v1127_v44 = vrot.slane %v2375_v31, %v2337_v46 }
 0x32d   : >> { %v1211_v38 = vmul.f32 %v1210_v47, %v2293_v8  ;;  %v1212_v17 = vmul.f32 %v1210_v47, %v2295_v9 }
 0x32f   : >> { %876 = vbcast.lane.b32.xlu1 %v870_v49, 264  ;;  %872 = vbcast.lane.b32.xlu0 %v870_v49, 256  ;;  %v1213_v19 = vmul.f32 1.442695, %v1211_v38 }
 0x330   : >> { %v1800_v32 = vpop.eup %1799 }
 0x331   : >> { %v1006_v41 = vmul.f32 %v2041_v10, %v1800_v32  ;;  %v1802_v45 = vpop.eup %1801  ;;  %v1215_v32 = vmul.f32 1.442695, %v1212_v17 }
 0x332   : >> { %v1007_v10 = vmul.f32 %v2037_v11, %v1802_v45 }
 0x333   : >> { %887 = vbcast.lane.b32.xlu1 %v881_v51, 264  ;;  %883 = vbcast.lane.b32.xlu0 %v881_v51, 256 }
 0x337   : >> { %911 = vbcast.lane.b32.xlu1 %v905_v53, 264  ;;  %907 = vbcast.lane.b32.xlu0 %v905_v53, 256  ;;  %v1180_v53 = vmul.f32 %v1179_v33, %v2293_v8 }
 0x339   : >> { %v1182_v3 = vmul.f32 1.442695, %v1180_v53 }
 0x33b   : >> { %922 = vbcast.lane.b32.xlu1 %v916_v54, 264  ;;  %918 = vbcast.lane.b32.xlu0 %v916_v54, 256 }
 0x33f   : >> { %933 = vbcast.lane.b32.xlu1 %v927_v55, 264  ;;  %929 = vbcast.lane.b32.xlu0 %v927_v55, 256  ;;  %v1151_v55 = vmul.f32 1.442695, %v1149_v40 }
 0x341   : >> { %1819 = vpow2.f32 %v1151_v55 }
 0x343   : >> { %898 = vbcast.lane.b32.xlu1 %v892_v57, 264  ;;  %894 = vbcast.lane.b32.xlu0 %v892_v57, 256  ;;  %v1804_v57 = vpop.eup %1803 }
 0x344   : >> { %v1806_v4 = vpop.eup %1805 }
 0x345   : >> { %v1808_v11 = vpop.eup %1807 }
 0x346   : >> { %v1810_v21 = vpop.eup %1809 }
 0x347   : >> { %944 = vbcast.lane.b32.xlu1 %v938_v60, 264  ;;  %940 = vbcast.lane.b32.xlu0 %v938_v60, 256  ;;  %v1812_v26 = vpop.eup %1811 }
 0x34b   : >> { %955 = vbcast.lane.b32.xlu1 %v949_v61, 264  ;;  %951 = vbcast.lane.b32.xlu0 %v949_v61, 256  ;;  %v1153_v61 = vmul.f32 1.442695, %v1150_v43 }
 0x34d   : >> { %1821 = vpow2.f32 %v1153_v61 }
 0x34e   : >> { %1823 = vpow2.f32 %v1182_v3 }
 0x34f   : >> { %966 = vbcast.lane.b32.xlu1 %v960_v62, 264  ;;  %962 = vbcast.lane.b32.xlu0 %v960_v62, 256  ;;  %v1181_v62 = vmul.f32 %v1179_v33, %v2295_v9  ;;  %v1814_v33 = vpop.eup %1813  ;;  %v1832_v9 = vld [vmem:[%s2597_s8 + $0x10] sm:$0xff] (%p799_p12)  }
 0x350   : >> { %v1816_v40 = vpop.eup %1815 }
 0x351   : >> { %v1184_v14 = vmul.f32 1.442695, %v1181_v62  ;;  %v1818_v46 = vpop.eup %1817 }
 0x353   : >> { %977 = vbcast.lane.b32.xlu1 %v971_v63, 264  ;;  %973 = vbcast.lane.b32.xlu0 %v971_v63, 256  ;;  %1825 = vpow2.f32 %v1184_v14 }
 0x354   : >> { %1827 = vpow2.f32 %v1213_v19 }
 0x355   : >> { %1829 = vpow2.f32 %v1215_v32 }
 0x357   : >> { %988 = vbcast.lane.b32.xlu1 %v982_v0, 264  ;;  %984 = vbcast.lane.b32.xlu0 %v982_v0, 256 }
 0x38d   : >> { %v829_v49 = vpop.permute.xlu1 %828  ;;  %v818_v51 = vpop.permute.xlu0 %817 }
 0x38e   : >> { %v1004_v54 = vmul.f32 %v1003_v36, %v818_v51  ;;  %v1035_v5 = vmul.f32 %v1034_v39, %v829_v49  ;;  %v1158_v49 = vrot.slane %v2375_v31, %v2340_v48 }
 0x390   : >> { %v2389_v60 = vadd.f32 %v1006_v41, %v1004_v54  ;;  %v1820_v54 = vpop.eup %1819 }
 0x391   : >> { %v833_v63 = vpop.permute.xlu1 %832  ;;  %v822_v0 = vpop.permute.xlu0 %821 }
 0x392   : >> { %v1005_v6 = vmul.f32 %v1003_v36, %v822_v0  ;;  %v1037_v7 = vmul.f32 %v1804_v57, %v2389_v60  ;;  %v1036_v22 = vmul.f32 %v1034_v39, %v833_v63  ;;  %v1189_v63 = vrot.slane %v2375_v31, %v2343_v50 }
 0x394   : >> { %v2396_v12 = vadd.f32 %v1007_v10, %v1005_v6  ;;  %v2398_v13 = vadd.f32 %v1037_v7, %v1035_v5  ;;  %v1822_v10 = vpop.eup %1821 }
 0x395   : >> { %v844_v15 = vpop.permute.xlu1 %843  ;;  %v840_v16 = vpop.permute.xlu0 %839 }
 0x396   : >> { %v1066_v23 = vmul.f32 %v1065_v1, %v840_v16  ;;  %v1038_v24 = vmul.f32 %v1806_v4, %v2396_v12  ;;  %v1068_v25 = vmul.f32 %v1808_v11, %v2398_v13  ;;  %v1067_v34 = vmul.f32 %v1065_v1, %v844_v15  ;;  %v1824_v0 = vpop.eup %1823 }
 0x397   : >> { %v1826_v6 = vpop.eup %1825 }
 0x398   : >> { %v2405_v27 = vadd.f32 %v1038_v24, %v1036_v22  ;;  %v2407_v28 = vadd.f32 %v1068_v25, %v1066_v23  ;;  %v1828_v14 = vpop.eup %1827 }
 0x399   : >> { %v855_v29 = vpop.permute.xlu1 %854  ;;  %v851_v30 = vpop.permute.xlu0 %850 }
 0x39a   : >> { %v1097_v35 = vmul.f32 %v1096_v42, %v851_v30  ;;  %v1069_v36 = vmul.f32 %v1810_v21, %v2405_v27  ;;  %v1099_v37 = vmul.f32 %v1812_v26, %v2407_v28  ;;  %v1098_v51 = vmul.f32 %v1096_v42, %v855_v29  ;;  %v1830_v24 = vpop.eup %1829 }
 0x39c   : >> { %v1071_v41 = vadd.f32 %v1069_v36, %v1067_v34  ;;  %v2413_v43 = vadd.f32 %v1099_v37, %v1097_v35 }
 0x39d   : >> { %v866_v45 = vpop.permute.xlu1 %865  ;;  %v862_v47 = vpop.permute.xlu0 %861 }
 0x39e   : >> { %v1128_v52 = vmul.f32 %v1127_v44, %v862_v47  ;;  %v1100_v53 = vmul.f32 %v1814_v33, %v1071_v41  ;;  %v1130_v39 = vmul.f32 %v1816_v40, %v2413_v43  ;;  %v1129_v48 = vmul.f32 %v1127_v44, %v866_v45 }
 0x3a0   : >> { %v2418_v55 = vadd.f32 %v1100_v53, %v1098_v51  ;;  %v2420_v57 = vadd.f32 %v1130_v39, %v1128_v52 }
 0x3a1   : >> { %v877_v61 = vpop.permute.xlu1 %876  ;;  %v873_v62 = vpop.permute.xlu0 %872 }
 0x3a2   : >> { %v1159_v1 = vmul.f32 %v1158_v49, %v873_v62  ;;  %v1131_v3 = vmul.f32 %v1818_v46, %v2418_v55  ;;  %v1161_v38 = vmul.f32 %v1820_v54, %v2420_v57  ;;  %v1160_v15 = vmul.f32 %v1158_v49, %v877_v61 }
 0x3a3   : >> { %v1220_v54 = vrot.slane %v2375_v31, %v2350_v56 }
 0x3a4   : >> { %v2426_v4 = vadd.f32 %v1131_v3, %v1129_v48  ;;  %v2428_v5 = vadd.f32 %v1161_v38, %v1159_v1 }
 0x3a5   : >> { %v888_v7 = vpop.permute.xlu1 %887  ;;  %v884_v11 = vpop.permute.xlu0 %883 }
 0x3a6   : >> { %v1190_v16 = vmul.f32 %v1189_v63, %v884_v11  ;;  %v1162_v42 = vmul.f32 %v1822_v10, %v2426_v4  ;;  %v1192_v50 = vmul.f32 %v1824_v0, %v2428_v5  ;;  %v1191_v21 = vmul.f32 %v1189_v63, %v888_v7 }
 0x3a8   : >> { %v2432_v17 = vadd.f32 %v1162_v42, %v1160_v15  ;;  %v2434_v19 = vadd.f32 %v1192_v50, %v1190_v16 }
 0x3a9   : >> { %v912_v22 = vpop.permute.xlu1 %911  ;;  %v908_v23 = vpop.permute.xlu0 %907 }
 0x3aa   : >> { %v1011_v25 = vmul.f32 %v2396_v12, %v912_v22  ;;  %v1010_v26 = vmul.f32 %v2389_v60, %v908_v23  ;;  %v1193_v29 = vmul.f32 %v1826_v6, %v2432_v17  ;;  %v1223_v30 = vmul.f32 %v1828_v14, %v2434_v19 }
 0x3ac   : >> { %v1013_v44 = vsel %vm482_vm4, %v1011_v25, 0.0  ;;  %v1012_v32 = vsel %vm482_vm4, %v1010_v26, 0.0  ;;  %v2442_v33 = vadd.f32 %v1193_v29, %v1191_v21 }
 0x3ad   : >> { %v1014_v34 = vadd.f32 %v1013_v44, %v1012_v32  ;;  %v923_v35 = vpop.permute.xlu1 %922  ;;  %v919_v36 = vpop.permute.xlu0 %918 }
 0x3ae   : >> { %v1042_v37 = vmul.f32 %v2405_v27, %v923_v35  ;;  %v1041_v40 = vmul.f32 %v2398_v13, %v919_v36  ;;  %v1224_v12 = vmul.f32 %v1830_v24, %v2442_v33 }
 0x3af   : >> { %v1015_v60 = vrot.slane %v1014_v34, 4 }
 0x3b0   : >> { %v1044_v45 = vsel %vm482_vm4, %v1042_v37, 0.0  ;;  %v1043_v47 = vsel %vm482_vm4, %v1041_v40, 0.0 }
 0x3b1   : >> { %v1016_v49 = vadd.f32 %v1015_v60, %v1014_v34  ;;  %v1045_v46 = vadd.f32 %v1044_v45, %v1043_v47  ;;  %v934_v51 = vpop.permute.xlu1 %933  ;;  %v930_v52 = vpop.permute.xlu0 %929 }
 0x3b2   : >> { %v1073_v53 = vmul.f32 %v1071_v41, %v934_v51  ;;  %v1072_v39 = vmul.f32 %v2407_v28, %v930_v52 }
 0x3b3   : >> { %v1017_v27 = vrot.slane %v1016_v49, 2  ;;  %v1046_v10 = vrot.slane %v1045_v46, 4 }
 0x3b4   : >> { %v1075_v13 = vsel %vm482_vm4, %v1073_v53, 0.0  ;;  %v1074_v61 = vsel %vm482_vm4, %v1072_v39, 0.0 }
 0x3b5   : >> { %v1018_v62 = vadd.f32 %v1017_v27, %v1016_v49  ;;  %v1047_v63 = vadd.f32 %v1046_v10, %v1045_v46  ;;  %v1076_v0 = vadd.f32 %v1075_v13, %v1074_v61  ;;  %v899_v48 = vpop.permute.xlu1 %898  ;;  %v895_v1 = vpop.permute.xlu0 %894 }
 0x3b6   : >> { %v1222_v3 = vmul.f32 %v1220_v54, %v899_v48  ;;  %v1221_v38 = vmul.f32 %v1220_v54, %v895_v1 }
 0x3b7   : >> { %v1048_v6 = vrot.slane %v1047_v63, 2  ;;  %v1077_v41 = vrot.slane %v1076_v0, 4  ;;  %v1019_v56 = vrot.slane %v1018_v62, 1 }
 0x3b8   : >> { %v2454_v11 = vadd.f32 %v1224_v12, %v1222_v3   ;;  %v2456_v10 = vadd.f32 %v1223_v30, %v1221_v38  }
 0x3b9   : >> { %v1049_v31 = vadd.f32 %v1048_v6, %v1047_v63  ;;  %v1078_v14 = vadd.f32 %v1077_v41, %v1076_v0  ;;  %v945_v15 = vpop.permute.xlu1 %944  ;;  %v941_v16 = vpop.permute.xlu0 %940  ;;  %v1020_v25 = vadd.f32 %v1019_v56, %v1018_v62 }
 0x3ba   : >> { %v2621_v28 = vmov %v2454_v11  ;;  %v2622_v7 = vmov %v2456_v10  ;;  %v1104_v42 = vmul.f32 %v2418_v55, %v945_v15  ;;  %v1103_v50 = vmul.f32 %v2413_v43, %v941_v16 }
 0x3bb   : >> { %v1050_v21 = vrot.slane %v1049_v31, 1  ;;  %v1079_v22 = vrot.slane %v1078_v14, 2  ;;  %1253 = vst.msk [vmem:[#allocation2] sm:$0xff] (%p799_p12), %vm482_vm4, %v2622_v7  ;;  %1254 = vst.msk [vmem:[#allocation2 + $0x8] sm:$0xff] (%p799_p12), %vm482_vm4, %v2621_v28 }
 0x3bc   : >> { %v1106_v23 = vsel %vm482_vm4, %v1104_v42, 0.0  ;;  %v1105_v24 = vsel %vm482_vm4, %v1103_v50, 0.0 }
 0x3bd   : >> { %v1051_v26 = vadd.f32 %v1050_v21, %v1049_v31  ;;  %v1080_v11 = vadd.f32 %v1079_v22, %v1078_v14  ;;  %v1107_v29 = vadd.f32 %v1106_v23, %v1105_v24  ;;  %v956_v30 = vpop.permute.xlu1 %955  ;;  %v952_v44 = vpop.permute.xlu0 %951 }
 0x3be   : >> { %v1135_v32 = vmul.f32 %v2426_v4, %v956_v30  ;;  %v1134_v34 = vmul.f32 %v2420_v57, %v952_v44 }
 0x3bf   : >> { %v1238_v55 = vsel %vm728_vm6, %v1020_v25, %v1051_v26  ;;  %v1081_v35 = vrot.slane %v1080_v11, 1  ;;  %v1108_v43 = vrot.slane %v1107_v29, 4 }
 0x3c0   : >> { %v1137_v36 = vsel %vm482_vm4, %v1135_v32, 0.0  ;;  %v1136_v37 = vsel %vm482_vm4, %v1134_v34, 0.0 }
 0x3c1   : >> { %v1082_v40 = vadd.f32 %v1081_v35, %v1080_v11  ;;  %v1109_v12 = vadd.f32 %v1108_v43, %v1107_v29  ;;  %v1138_v60 = vadd.f32 %v1137_v36, %v1136_v37  ;;  %v967_v45 = vpop.permute.xlu1 %966  ;;  %v963_v47 = vpop.permute.xlu0 %962 }
 0x3c2   : >> { %v1166_v49 = vmul.f32 %v2432_v17, %v967_v45  ;;  %v1165_v4 = vmul.f32 %v2428_v5, %v963_v47  ;;  %v1268_v45 = vsub.f32 (%p799_p12), 0.0, %v2269_v18  ;;  %v1269_v47 = vsub.f32 (%p799_p12), 0.0, %v2273_v20 }
 0x3c3   : >> { %v1240_v46 = vsel %vm1239_vm11, %v1238_v55, %v1082_v40  ;;  %v1110_v57 = vrot.slane %v1109_v12, 2  ;;  %v1139_v51 = vrot.slane %v1138_v60, 4 }
 0x3c4   : >> { %v1168_v52 = vsel %vm482_vm4, %v1166_v49, 0.0  ;;  %v1167_v53 = vsel %vm482_vm4, %v1165_v4, 0.0  ;;  %v1831_v49 = vld [vmem:[%s2597_s8 + $0x18] sm:$0xff] (%p799_p12)   ;;  %v1270_v4 = vmul.f32 (%p799_p12), 1.442695, %v1268_v45 }
 0x3c5   : >> { %v1111_v39 = vadd.f32 %v1110_v57, %v1109_v12  ;;  %v1140_v54 = vadd.f32 %v1139_v51, %v1138_v60  ;;  %v1169_v27 = vadd.f32 %v1168_v52, %v1167_v53  ;;  %v978_v10 = vpop.permute.xlu1 %977  ;;  %v974_v13 = vpop.permute.xlu0 %973  ;;  %v1272_v8 = vmul.f32 (%p799_p12), 1.442695, %v1269_v47  ;;  %1616 = vmatpush3.bf16.msra.mxu0 (%p799_p12), %v1831_v49  ;;  %v1833_v51 = vld [vmem:[%s2597_s8 + $0x8] sm:$0xff] (%p799_p12)   ;;  %v1834_v52 = vld [vmem:[%s2597_s8] sm:$0xff] (%p799_p12)  }
 0x3c6   : >> { %v1197_v61 = vmul.f32 %v2442_v33, %v978_v10  ;;  %v1196_v62 = vmul.f32 %v2434_v19, %v974_v13  ;;  %v2624_v10 = vmov %v2622_v7  ;;  %1617 = vmatprep.subr.bf16.mxu0 (%p799_p12), %v2055_v2  ;;  %1835 = vpow2.f32 (%p799_p12), %v1270_v4 }
 0x3c7   : >> { %v1112_v63 = vrot.slane %v1111_v39, 1  ;;  %v1141_v17 = vrot.slane %v1140_v54, 2  ;;  %v1170_v0 = vrot.slane %v1169_v27, 4  ;;  %1837 = vpow2.f32 (%p799_p12), %v1272_v8 }
 0x3c8   : >> { %v1199_v5 = vsel %vm482_vm4, %v1197_v61, 0.0  ;;  %v1198_v48 = vsel %vm482_vm4, %v1196_v62, 0.0 }
 0x3c9   : >> { %v1113_v1 = vadd.f32 %v1112_v63, %v1111_v39  ;;  %v1142_v3 = vadd.f32 %v1141_v17, %v1140_v54  ;;  %v1171_v38 = vadd.f32 %v1170_v0, %v1169_v27  ;;  %v1200_v6 = vadd.f32 %v1199_v5, %v1198_v48  ;;  %v989_v41 = vpop.permute.xlu1 %988  ;;  %v985_v56 = vpop.permute.xlu0 %984  ;;  %1618 = vmatpush3.bf16.msra.mxu0 (%p799_p12), %v1832_v9 }
 0x3ca   : >> { %v1228_v31 = vmul.f32 %v2621_v28, %v989_v41  ;;  %v1227_v33 = vmul.f32 %v2622_v7, %v985_v56  ;;  %1619 = vmatprep.subr.bf16.mxu0 (%p799_p12), %v2055_v2 }
 0x3cb   : >> { %v1242_v14 = vsel %vm1241_vm12, %v1240_v46, %v1113_v1  ;;  %v1143_v19 = vrot.slane %v1142_v3, 1  ;;  %v1172_v15 = vrot.slane %v1171_v38, 2  ;;  %v1201_v16 = vrot.slane %v1200_v6, 4 }
 0x3cc   : >> { %v1230_v42 = vsel %vm482_vm4, %v1228_v31, 0.0  ;;  %v1229_v50 = vsel %vm482_vm4, %v1227_v33, 0.0 }
 0x3cd   : >> { %v1144_v21 = vadd.f32 %v1143_v19, %v1142_v3  ;;  %v1173_v22 = vadd.f32 %v1172_v15, %v1171_v38  ;;  %v1202_v23 = vadd.f32 %v1201_v16, %v1200_v6  ;;  %v1231_v24 = vadd.f32 %v1230_v42, %v1229_v50  ;;  %1620 = vmatpush3.bf16.msra.mxu0 (%p799_p12), %v1833_v51 }
 0x3ce   : > { %1621 = vmatprep.subr.bf16.mxu0 (%p799_p12), %v2055_v2  ;;  %v1562_v2 = vld [vmem:[%s2596_s7] ss:$0 sm:$0xff] (%p799_p12) }
 0x3cf   : >> { %v1244_v25 = vsel %vm1243_vm13, %v1242_v14, %v1144_v21  ;;  %v1174_v26 = vrot.slane %v1173_v22, 1  ;;  %v1203_v11 = vrot.slane %v1202_v23, 2  ;;  %v1232_v29 = vrot.slane %v1231_v24, 4 }
 0x3d0   : > { %v1264_v10 = vmul.f32 (%p799_p12), %v1562_v2, %v2282_v58  ;;  %v1265_v13 = vmul.f32 (%p799_p12), %v1562_v2, %v2284_v59 }
 0x3d1   : >> { %v1175_v30 = vadd.f32 %v1174_v26, %v1173_v22  ;;  %v1204_v44 = vadd.f32 %v1203_v11, %v1202_v23  ;;  %v1233_v32 = vadd.f32 %v1232_v29, %v1231_v24  ;;  %v2623_v11 = vmov %v2621_v28  ;;  %1622 = vmatpush3.bf16.msra.mxu0 (%p799_p12), %v1834_v52 }
 0x3d3   : >> { %v1246_v34 = vsel %vm1245_vm14, %v1244_v25, %v1175_v30  ;;  %v1205_v55 = vrot.slane %v1204_v44, 1  ;;  %v1234_v35 = vrot.slane %v1233_v32, 2  ;;  %v1836_v28 = vpop.eup (%p799_p12), %1835 }
 0x3d4   : > { %v1838_v7 = vpop.eup (%p799_p12), %1837  ;;  %v1274_v46 = vadd.f32 (%p799_p12), 1.0, %v1836_v28 }
 0x3d5   : >> { %v1206_v43 = vadd.f32 %v1205_v55, %v1204_v44  ;;  %v1235_v36 = vadd.f32 %v1234_v35, %v1233_v32  ;;  %v1275_v57 = vadd.f32 (%p799_p12), 1.0, %v1838_v7 }
 0x3d6   : > { %1839 = vrcp.f32 (%p799_p12), %v1274_v46 }
 0x3d7   : >> { %v1248_v37 = vsel %vm1247_vm15, %v1246_v34, %v1206_v43  ;;  %v1236_v40 = vrot.slane %v1235_v36, 1  ;;  %1841 = vrcp.f32 (%p799_p12), %v1275_v57 }
 0x3d8   : > { %801 = sbr.rel (!%p799_p12) target bundleno = 787 (0x313), region = 120 }
 0x3d9   : >> { %v1237_v12 = vadd.f32 %v1236_v40, %v1235_v36 }
 0x3db   : >> { %v1250_v60 = vsel %vm1249_vm0, %v1248_v37, %v1237_v12 }
 0x3dc   : >> { %1252 = vst.msk [vmem:[%s1251_s29] sm:$0xff] %vm482_vm4, %v1250_v60  ;;  %s1570_s29 = sshll.u32 (%p799_p12), %s2021_s13, 2  ;;  %s2538_s13 = scalar_lea.sflag (%p799_p12), [#allocation11], %s390_s15 }
 0x3dd   : > { %s1384_s12 = sadd.s32 %s1570_s29, %s2237_s27  ;;  %s1921_s27 = scalar_lea.vmem %s2532_s26, 256 }
 0x3de   : > { %s1571_s18 = sshll.u32 %s1384_s12, 7  ;;  %p1922_p0 = scmp.ne.s32.totalorder %s2532_s26, %s1921_s27 }
 0x3df   : > { %s2530_s28 = scalar_lea.hbm %s2598_s9, %s1571_s18 }
 0x3e0   : > { %p1923_p6 = pnand %p1922_p0, %p2625_p1 }
 0x3e2   : > { %p1924_p7 = pneg %p1923_p6 }
 0x3e3   : > { %v1840_v53 = vpop.eup %1839  ;;  %v1255_v61 = vld [vmem:[#allocation8] sm:$0xff]  ;;  %v1256_v62 = vld [vmem:[#allocation8 + $0x8] sm:$0xff] }
 0x3e4   : > { %v1842_v39 = vpop.eup %1841  ;;  %v1280_v54 = vmul.f32 %v1840_v53, %v2269_v18  ;;  %v1266_v63 = vadd.f32 %v1264_v10, %v1255_v61  ;;  %v1267_v17 = vadd.f32 %v1265_v13, %v1256_v62 }
 0x3e5   : > { %v1281_v27 = vmul.f32 %v1842_v39, %v2273_v20 }
 0x3e6   : > { %1284 = vrot.lane.b32.xlu0 %v1280_v54, %s2058_s11 }
 0x3ea   : > { %1286 = vrot.lane.b32.xlu0 %v1281_v27, %s2058_s11  ;;  %s1927_s11 = scalar_lea.vmem %s1926_s14, 512 }
 0x3eb   : > { %p1929_p11 = scmp.lt.s32.totalorder %s1927_s11, %s1921_s27 }
 0x3ed   : > { %p1930_p13 = por %p1929_p11, %p1928_p9 }
 0x3ef   : > { %p1931_p2 = pnand %p1930_p13, %p1924_p7 }
 0x458   : > { %v1285_v18 = vpop.permute.xlu0 %1284 }
 0x459   : > { %v1290_v20 = vmul.f32 %v1285_v18, %v1266_v63 }
 0x45c   : > { %v1287_v0 = vpop.permute.xlu0 %1286 }
 0x45d   : > { %v1291_v5 = vmul.f32 %v1287_v0, %v1267_v17 }
 0x45f   : > { %v1292_v48 = vpack.c.bf16 %v1291_v5, %v1290_v20 }
 0x461   : > { %1624 = vmatmul.mubr.msk.bf16.vlgmr.msra.gmra.mxu0 %vm482_vm4, %v1292_v48 }
 0x521   : > { %v1362_v58 = vpop.f32.mrf.mxu0 }
 0x522   : > { %1369 = vst.msk [vmem:[%s2248_s19] sm:$0xff] %vm437_vm3, %v1362_v58 }
 0x523   : > { %v1625_v59 = vpop.f32.mrf.mxu0 }
 0x525   : > { %v1365_v1 = vpop.f32.mrf.mxu0 }
 0x526   : > { %1370 = vst.msk [vmem:[%s2248_s19 + $0x8] sm:$0xff] %vm437_vm3, %v1365_v1 }
 0x527   : > { %v1626_v3 = vpop.f32.mrf.mxu0 }
 0x528   : > { %1934 = shalt.err (!%p1931_p2)
}
 0x529   : > { %s1935_s15 = scalar_lea.hbm %s2530_s28, 256  ;;  %s1939_s21 = scalar_lea.hbm %s2598_s9, 1024 }
 0x52a   : > { %p1936_p4 = scmp.ne.s32.totalorder %s2530_s28, %s1935_s15  ;;  %p1940_p8 = scmp.lt.s32.totalorder %s2530_s28, %s2598_s9 }
 0x52b   : > { %p1941_p10 = scmp.lt.s32.totalorder %s1939_s21, %s1935_s15 }
 0x52c   : > { %p1937_p5 = pnand %p1936_p4, %p2625_p1 }
 0x52d   : > { %p1942_p12 = por %p1941_p10, %p1940_p8 }
 0x52e   : > { %p1938_p3 = pneg %p1937_p5 }
 0x530   : > { %p1943_p0 = pnand %p1942_p12, %p1938_p3 }
 0x532   : > { %1946 = shalt.err (!%p1943_p0)
}
 0x533   : > { %s2060_s18 = smov 128   ;;  %s2061_s22 = smov 8  }
 0x534   : > { %1639 = dma.vmem_to_hbm [thread:$0]  (%p2625_p1), %s2532_s26, 256, %s2530_s28, %s2538_s13, %s2060_s18, %s2060_s18, %s2061_s22  }
 0x535 PF: > { %p1661_p6 = scmp.ge.s32.totalorder %s2033_s16, 2  ;;  %s1402_s20 = sand.u32 1, %s2005_s30  }
 0x536   : > { %p2626_p7 = scmp.ne.s32.totalorder %s2614_s24, 0  ;;  %s1403_s27 = scalar_lea.sflag [#allocation11], %s1402_s20 }
 0x538   : > { %p1652_p9 = pnand %p1661_p6, %p2626_p7 }
 0x53a   : > { %p1653_p11 = pneg %p1652_p9 }
 0x53c   : > { %2000 = dma.done.wait (%p1653_p11), %s1403_s27, 256  }
 0x53d   : > { %2002 = vsyncadd (%p1653_p11), %s1403_s27, 4294967040  ;;  %s24_s16 = sadd.s32 1, %s2033_s16   ;;  %s2627_s25 = sld [smem:[#allocation19_spill]] }
 0x53e   : > { %p21_p13 = scmp.ge.s32.totalorder %s24_s16, 6   ;;  %s2628_s11 = sld [smem:[#allocation24_spill]] }
 0x53f   : > { %s2629_s12 = sld [smem:[#allocation20_spill]]  ;;  %s2633_s30 = smov %s2009_s10 }
 0x540   : > { %s2630_s13 = sld [smem:[#allocation21_spill]]  ;;  %23 = sbr.rel (!%p21_p13) target bundleno = 7 (0x7), region = 131 }
 0x541   : > { %s2631_s14 = sld [smem:[#allocation22_spill]] }
 0x542   : > { %s2632_s15 = sld [smem:[#allocation23_spill]] }
 0x543   : > { %s2634_s10 = smov %s2627_s25 }
 0x545   :  { %1408 = vsyncpa [#allocation10], 1 }
 0x546   :  { %1410 = vsyncpa [#allocation10 + $0x1], 1 }
 0x547   :  { %1411 = vsyncpa [#allocation13], 1 }
 0x548   :  { %1412 = vsyncpa [#allocation11], 1 }
 0x549   :  { %1414 = vsyncpa [#allocation11 + $0x1], 1 }

</bundles_post_ra>
